<compile_context>
chip_gen: v7x
topology: tpu7x:2x2x1
jax: 0.10.0
libtpu: 0.0.40
codegen_flags: <defaults>
</compile_context>

<pallas_src>
import functools

import jax
import jax.numpy as jnp
from jax import lax
from jax.experimental import pallas as pl
from jax.experimental.pallas import tpu as pltpu


def make_gat_kernel(N, DOUT, H, read_out):
    NEG_BIG = -1e30
    HD = H * DOUT

    def kernel(feat_ref, adj_ref, w1_ref, b1_ref, wfc_ref,
               al_ref, ar_ref, hmask_ref, gb_ref, wc_ref, bc_ref, out_ref):
        feat = feat_ref[0]                                   # [N, DIN] bf16
        adj = adj_ref[0]                                     # [N, N]   bf16
        mask = adj > 0                                       # bool edge mask

        # reduction_linear + dropout(eval = identity)
        z = jnp.dot(feat, w1_ref[...],
                    preferred_element_type=jnp.float32) + b1_ref[...]   # [N, DOUT] f32

        # GATConv fc (bias=False): all heads fused along the lane axis
        hf = jnp.dot(z.astype(jnp.bfloat16), wfc_ref[...],
                     preferred_element_type=jnp.float32)     # [N, HD] f32
        hf_bf = hf.astype(jnp.bfloat16)

        # Attention logits for ALL heads with two lane-contracting matmuls:
        #   er_all[i, h] = sum_d hf[i, h*DOUT+d] * attn_r[h, d]
        #   el_t [h, j] = sum_d hf[j, h*DOUT+d] * attn_l[h, d]
        er_all = lax.dot_general(hf_bf, ar_ref[...], (((1,), (1,)), ((), ())),
                                 preferred_element_type=jnp.float32)    # [N, H]
        el_t = lax.dot_general(al_ref[...], hf_bf, (((1,), (1,)), ((), ())),
                               preferred_element_type=jnp.float32)      # [H, N]

        # Per-destination edge softmax per head (softmax math kept in f32).
        alphas = []
        for h in range(H):                                   # static, H is tiny
            e = er_all[:, h:h + 1] + el_t[h:h + 1, :]        # [N, N]
            e = jnp.where(e > 0, e, 0.2 * e)                 # leaky_relu(0.2)
            e = jnp.where(mask, e, NEG_BIG)
            m = jnp.max(e, axis=-1, keepdims=True)
            p = jnp.where(mask, jnp.exp(e - m), 0.0)         # zero-in-degree -> all-zero row
            denom = jnp.sum(p, axis=-1, keepdims=True)
            inv = pl.reciprocal(jnp.maximum(denom, 1e-12), approx=True)
            alphas.append((p * inv).astype(jnp.bfloat16))
        alpha_all = jnp.concatenate(alphas, axis=1)          # [N, H*N] bf16

        # Block-diagonal feature stack -> single K = H*N aggregation matmul.
        # hh_bd[h*N + n, h*DOUT + d] = hf[n, h*DOUT + d], zero off-diagonal.
        hh_tiled = jnp.broadcast_to(hf_bf[None], (H, N, HD)).reshape(H * N, HD)
        hh_bd = hh_tiled * hmask_ref[...]                    # [H*N, HD] bf16

        agg = jnp.dot(alpha_all, hh_bd,
                      preferred_element_type=jnp.float32)    # [N, HD] f32
        agg = agg + gb_ref[...]                              # per-head GATConv bias
        agg = jnp.where(agg > 0, agg, 0.01 * agg)            # gat_layer_activation

        # mean over heads
        acc = agg[:, 0:DOUT]
        for h in range(1, H):
            acc = acc + agg[:, h * DOUT:(h + 1) * DOUT]
        node_h = acc * (1.0 / H)                             # [N, DOUT]

        # graph readout
        feats = jnp.sum(node_h, axis=0, keepdims=True)       # [1, DOUT]
        if read_out == "mean":
            feats = feats * (1.0 / N)

        # classifier
        out_ref[0] = jnp.dot(feats, wc_ref[...],
                             preferred_element_type=jnp.float32) + bc_ref[...]

    return kernel


@functools.partial(jax.jit, static_argnames=("read_out",))
def gat_forward(feat, adj, w1, b1, wfc, attn_l, attn_r, gat_bias, wc, bc,
                read_out="mean"):
    B, N, DIN = feat.shape
    DOUT = w1.shape[1]
    H = attn_l.shape[0]
    HD = H * DOUT

    # bf16 MXU operands / bf16 O(N^2) adjacency (0/1 is exact in bf16).
    feat_bf = feat.astype(jnp.bfloat16)
    adj_bf = adj.astype(jnp.bfloat16)
    w1_bf = w1.astype(jnp.bfloat16)
    wfc_bf = wfc.astype(jnp.bfloat16)

    # Block-expanded attention vectors: row h holds attn_{l,r}[h] in its own
    # DOUT-wide head slice, zeros elsewhere -> one matmul covers all heads.
    eye = jnp.eye(H, dtype=jnp.float32)
    al_mat = (eye[:, :, None] * attn_l[None, :, :]).reshape(H, HD).astype(jnp.bfloat16)
    ar_mat = (eye[:, :, None] * attn_r[None, :, :]).reshape(H, HD).astype(jnp.bfloat16)

    # 0/1 block-diagonal mask for the fused aggregation matmul.
    row_head = jnp.arange(H * N) // N
    col_head = jnp.arange(HD) // DOUT
    head_mask = (row_head[:, None] == col_head[None, :]).astype(jnp.bfloat16)

    gb_flat = gat_bias.reshape(1, HD).astype(jnp.float32)

    kernel = make_gat_kernel(N, DOUT, H, read_out)

    out = pl.pallas_call(
        kernel,
        out_shape=jax.ShapeDtypeStruct((B, 1, 2), jnp.float32),
        grid=(B,),
        in_specs=[
            pl.BlockSpec((1, N, DIN), lambda b: (b, 0, 0)),      # feat (per graph)
            pl.BlockSpec((1, N, N), lambda b: (b, 0, 0)),        # adj  (per graph)
            pl.BlockSpec((DIN, DOUT), lambda b: (0, 0)),         # w1
            pl.BlockSpec((1, DOUT), lambda b: (0, 0)),           # b1
            pl.BlockSpec((DOUT, HD), lambda b: (0, 0)),          # wfc
            pl.BlockSpec((H, HD), lambda b: (0, 0)),             # al_mat
            pl.BlockSpec((H, HD), lambda b: (0, 0)),             # ar_mat
            pl.BlockSpec((H * N, HD), lambda b: (0, 0)),         # head_mask
            pl.BlockSpec((1, HD), lambda b: (0, 0)),             # gat bias (flat)
            pl.BlockSpec((DOUT, 2), lambda b: (0, 0)),           # wc
            pl.BlockSpec((1, 2), lambda b: (0, 0)),              # bc
        ],
        out_specs=pl.BlockSpec((1, 1, 2), lambda b: (b, 0, 0)),
        compiler_params=pltpu.CompilerParams(
            dimension_semantics=("parallel",),
            vmem_limit_bytes=32 * 1024 * 1024),
    )(feat_bf, adj_bf, w1_bf, b1, wfc_bf, al_mat, ar_mat, head_mask,
      gb_flat, wc, bc)

    return out.reshape(B, 2)


if __name__ == "__main__":
    # Small synthetic sizes consistent with the module.
    # NOTE: the original module feeds output_dim-sized features into a GATConv
    # declared with in_feats=input_dim, so we pick input_dim == output_dim.
    B, N, DIN, DOUT, H = 2, 64, 32, 32, 4

    key = jax.random.PRNGKey(0)
    ks = jax.random.split(key, 11)

    # node features and dense adjacency (adj[b, i, j] = 1 iff edge j -> i)
    feat = jax.random.normal(ks[0], (B, N, DIN), jnp.float32)
    adj = (jax.random.uniform(ks[1], (B, N, N)) < 0.3).astype(jnp.float32)

    # reduction_linear: Linear(DIN, DOUT)
    w1 = (jax.random.normal(ks[2], (DIN, DOUT)) * 0.1).astype(jnp.float32)
    b1 = (jax.random.normal(ks[3], (1, DOUT)) * 0.1).astype(jnp.float32)

    # GATConv: fc Linear(DOUT -> H*DOUT, bias=False), attn_l/attn_r [H, DOUT], bias [H, DOUT]
    wfc = (jax.random.normal(ks[4], (DOUT, H * DOUT)) * 0.1).astype(jnp.float32)
    attn_l = (jax.random.normal(ks[5], (H, DOUT)) * 0.1).astype(jnp.float32)
    attn_r = (jax.random.normal(ks[6], (H, DOUT)) * 0.1).astype(jnp.float32)
    gat_bias = (jax.random.normal(ks[7], (H, DOUT)) * 0.1).astype(jnp.float32)

    # classifier: Linear(DOUT, 2)
    wc = (jax.random.normal(ks[8], (DOUT, 2)) * 0.1).astype(jnp.float32)
    bc = (jax.random.normal(ks[9], (1, 2)) * 0.1).astype(jnp.float32)

    result = gat_forward(feat, adj, w1, b1, wfc, attn_l, attn_r, gat_bias,
                         wc, bc, read_out="mean")
    jax.block_until_ready(result)
    assert result.shape == (B, 2)
    print("KERNEL_OK")
</pallas_src>

<mosaic_0001>
module attributes {stable_mosaic.version = 11 : i64} {
  func.func @kernel(%arg0: i32, %arg1: memref<1x64x32xbf16, #tpu.memory_space<vmem>>, %arg2: memref<1x64x64xbf16, #tpu.memory_space<vmem>>, %arg3: memref<32x32xbf16, #tpu.memory_space<vmem>>, %arg4: memref<1x32xf32, #tpu.memory_space<vmem>>, %arg5: memref<32x128xbf16, #tpu.memory_space<vmem>>, %arg6: memref<4x128xbf16, #tpu.memory_space<vmem>>, %arg7: memref<4x128xbf16, #tpu.memory_space<vmem>>, %arg8: memref<256x128xbf16, #tpu.memory_space<vmem>>, %arg9: memref<1x128xf32, #tpu.memory_space<vmem>>, %arg10: memref<32x2xf32, #tpu.memory_space<vmem>>, %arg11: memref<1x2xf32, #tpu.memory_space<vmem>>, %arg12: memref<1x1x2xf32, #tpu.memory_space<vmem>>) attributes {dimension_semantics = [#tpu.dimension_semantics<parallel>], iteration_bounds = array<i64: 2>, scalar_prefetch = 0 : i64, scratch_operands = 0 : i64, tpu.core_type = #tpu.core_type<tc>, window_params = [{transform_indices = @transform_0, window_bounds = array<i64: 1, 64, 32>}, {transform_indices = @transform_1, window_bounds = array<i64: 1, 64, 64>}, {pipeline_mode = #tpu.pipeline_mode<synchronous>, transform_indices = @transform_2, window_bounds = array<i64: 32, 32>}, {pipeline_mode = #tpu.pipeline_mode<synchronous>, transform_indices = @transform_3, window_bounds = array<i64: 1, 32>}, {pipeline_mode = #tpu.pipeline_mode<synchronous>, transform_indices = @transform_4, window_bounds = array<i64: 32, 128>}, {pipeline_mode = #tpu.pipeline_mode<synchronous>, transform_indices = @transform_5, window_bounds = array<i64: 4, 128>}, {pipeline_mode = #tpu.pipeline_mode<synchronous>, transform_indices = @transform_6, window_bounds = array<i64: 4, 128>}, {pipeline_mode = #tpu.pipeline_mode<synchronous>, transform_indices = @transform_7, window_bounds = array<i64: 256, 128>}, {pipeline_mode = #tpu.pipeline_mode<synchronous>, transform_indices = @transform_8, window_bounds = array<i64: 1, 128>}, {pipeline_mode = #tpu.pipeline_mode<synchronous>, transform_indices = @transform_9, window_bounds = array<i64: 32, 2>}, {pipeline_mode = #tpu.pipeline_mode<synchronous>, transform_indices = @transform_10, window_bounds = array<i64: 1, 2>}, {transform_indices = @transform_11, window_bounds = array<i64: 1, 1, 2>}]} {
    %c0 = arith.constant 0 : index
    %c0_0 = arith.constant 0 : index
    %c0_1 = arith.constant 0 : index
    %0 = vector.load %arg1[%c0, %c0_0, %c0_1] : memref<1x64x32xbf16, #tpu.memory_space<vmem>>, vector<1x64x32xbf16>
    %1 = vector.shape_cast %0 : vector<1x64x32xbf16> to vector<64x32xbf16>
    %c0_2 = arith.constant 0 : index
    %c0_3 = arith.constant 0 : index
    %c0_4 = arith.constant 0 : index
    %2 = vector.load %arg2[%c0_2, %c0_3, %c0_4] : memref<1x64x64xbf16, #tpu.memory_space<vmem>>, vector<1x64x64xbf16>
    %3 = vector.shape_cast %2 : vector<1x64x64xbf16> to vector<64x64xbf16>
    %cst = arith.constant 0.000000e+00 : bf16
    %4 = vector.broadcast %cst : bf16 to vector<64x64xbf16>
    %5 = arith.cmpf ogt, %3, %4 : vector<64x64xbf16>
    %c0_5 = arith.constant 0 : index
    %c0_6 = arith.constant 0 : index
    %6 = vector.load %arg3[%c0_5, %c0_6] : memref<32x32xbf16, #tpu.memory_space<vmem>>, vector<32x32xbf16>
    %cst_7 = arith.constant dense<0.000000e+00> : vector<64x32xf32>
    %7 = tpu.matmul %1, %6, %cst_7 {dimension_numbers = #tpu.dot_dimension_numbers<[1], [0], [0], [1], [0, 0, 1, 1], [], []>} : vector<64x32xbf16>, vector<32x32xbf16>, vector<64x32xf32> -> vector<64x32xf32>
    %c0_8 = arith.constant 0 : index
    %c0_9 = arith.constant 0 : index
    %8 = vector.load %arg4[%c0_8, %c0_9] : memref<1x32xf32, #tpu.memory_space<vmem>>, vector<1x32xf32>
    %9 = vector.broadcast %8 : vector<1x32xf32> to vector<64x32xf32>
    %10 = arith.addf %7, %9 : vector<64x32xf32>
    %11 = arith.truncf %10 : vector<64x32xf32> to vector<64x32xbf16>
    %c0_10 = arith.constant 0 : index
    %c0_11 = arith.constant 0 : index
    %12 = vector.load %arg5[%c0_10, %c0_11] : memref<32x128xbf16, #tpu.memory_space<vmem>>, vector<32x128xbf16>
    %cst_12 = arith.constant dense<0.000000e+00> : vector<64x128xf32>
    %13 = tpu.matmul %11, %12, %cst_12 {dimension_numbers = #tpu.dot_dimension_numbers<[1], [0], [0], [1], [0, 0, 1, 1], [], []>} : vector<64x32xbf16>, vector<32x128xbf16>, vector<64x128xf32> -> vector<64x128xf32>
    %14 = arith.truncf %13 : vector<64x128xf32> to vector<64x128xbf16>
    %c0_13 = arith.constant 0 : index
    %c0_14 = arith.constant 0 : index
    %15 = vector.load %arg7[%c0_13, %c0_14] : memref<4x128xbf16, #tpu.memory_space<vmem>>, vector<4x128xbf16>
    %cst_15 = arith.constant dense<0.000000e+00> : vector<64x4xf32>
    %16 = tpu.matmul %14, %15, %cst_15 {dimension_numbers = #tpu.dot_dimension_numbers<[1], [1], [0], [0], [0, 0, 1, 0], [], []>} : vector<64x128xbf16>, vector<4x128xbf16>, vector<64x4xf32> -> vector<64x4xf32>
    %c0_16 = arith.constant 0 : index
    %c0_17 = arith.constant 0 : index
    %17 = vector.load %arg6[%c0_16, %c0_17] : memref<4x128xbf16, #tpu.memory_space<vmem>>, vector<4x128xbf16>
    %cst_18 = arith.constant dense<0.000000e+00> : vector<4x64xf32>
    %18 = tpu.matmul %17, %14, %cst_18 {dimension_numbers = #tpu.dot_dimension_numbers<[1], [1], [0], [0], [0, 0, 1, 0], [], []>} : vector<4x128xbf16>, vector<64x128xbf16>, vector<4x64xf32> -> vector<4x64xf32>
    %19 = vector.extract_strided_slice %16 {offsets = [0, 0], sizes = [64, 1], strides = [1, 1]} : vector<64x4xf32> to vector<64x1xf32>
    %20 = vector.extract_strided_slice %18 {offsets = [0, 0], sizes = [1, 64], strides = [1, 1]} : vector<4x64xf32> to vector<1x64xf32>
    %21 = vector.broadcast %19 : vector<64x1xf32> to vector<64x64xf32>
    %22 = vector.broadcast %20 : vector<1x64xf32> to vector<64x64xf32>
    %23 = arith.addf %21, %22 : vector<64x64xf32>
    %cst_19 = arith.constant 0.000000e+00 : f32
    %24 = vector.broadcast %cst_19 : f32 to vector<64x64xf32>
    %25 = arith.cmpf ogt, %23, %24 : vector<64x64xf32>
    %cst_20 = arith.constant 2.000000e-01 : f32
    %26 = vector.broadcast %cst_20 : f32 to vector<64x64xf32>
    %27 = arith.mulf %26, %23 : vector<64x64xf32>
    %28 = arith.select %25, %23, %27 : vector<64x64xi1>, vector<64x64xf32>
    %cst_21 = arith.constant -1.000000e+30 : f32
    %29 = vector.broadcast %cst_21 : f32 to vector<64x64xf32>
    %30 = arith.select %5, %28, %29 : vector<64x64xi1>, vector<64x64xf32>
    %cst_22 = arith.constant dense<0xFF800000> : vector<64xf32>
    %31 = vector.multi_reduction <maximumf>, %30, %cst_22 [1] : vector<64x64xf32> to vector<64xf32>
    %32 = vector.shape_cast %31 : vector<64xf32> to vector<64x1xf32>
    %33 = vector.broadcast %32 : vector<64x1xf32> to vector<64x64xf32>
    %34 = arith.subf %30, %33 : vector<64x64xf32>
    %35 = math.exp %34 : vector<64x64xf32>
    %cst_23 = arith.constant 0.000000e+00 : f32
    %36 = vector.broadcast %cst_23 : f32 to vector<64x64xf32>
    %37 = arith.select %5, %35, %36 : vector<64x64xi1>, vector<64x64xf32>
    %cst_24 = arith.constant dense<0.000000e+00> : vector<64xf32>
    %38 = vector.multi_reduction <add>, %37, %cst_24 [1] : vector<64x64xf32> to vector<64xf32>
    %39 = vector.shape_cast %38 : vector<64xf32> to vector<64x1xf32>
    %cst_25 = arith.constant 9.99999996E-13 : f32
    %40 = vector.broadcast %cst_25 : f32 to vector<64x1xf32>
    %41 = arith.maximumf %39, %40 : vector<64x1xf32>
    %42 = tpu.reciprocal %41 {approx = true} : vector<64x1xf32> -> vector<64x1xf32>
    %43 = vector.broadcast %42 : vector<64x1xf32> to vector<64x64xf32>
    %44 = arith.mulf %37, %43 : vector<64x64xf32>
    %45 = arith.truncf %44 : vector<64x64xf32> to vector<64x64xbf16>
    %46 = vector.extract_strided_slice %16 {offsets = [0, 1], sizes = [64, 1], strides = [1, 1]} : vector<64x4xf32> to vector<64x1xf32>
    %47 = vector.extract_strided_slice %18 {offsets = [1, 0], sizes = [1, 64], strides = [1, 1]} : vector<4x64xf32> to vector<1x64xf32>
    %48 = vector.broadcast %46 : vector<64x1xf32> to vector<64x64xf32>
    %49 = vector.broadcast %47 : vector<1x64xf32> to vector<64x64xf32>
    %50 = arith.addf %48, %49 : vector<64x64xf32>
    %cst_26 = arith.constant 0.000000e+00 : f32
    %51 = vector.broadcast %cst_26 : f32 to vector<64x64xf32>
    %52 = arith.cmpf ogt, %50, %51 : vector<64x64xf32>
    %cst_27 = arith.constant 2.000000e-01 : f32
    %53 = vector.broadcast %cst_27 : f32 to vector<64x64xf32>
    %54 = arith.mulf %53, %50 : vector<64x64xf32>
    %55 = arith.select %52, %50, %54 : vector<64x64xi1>, vector<64x64xf32>
    %cst_28 = arith.constant -1.000000e+30 : f32
    %56 = vector.broadcast %cst_28 : f32 to vector<64x64xf32>
    %57 = arith.select %5, %55, %56 : vector<64x64xi1>, vector<64x64xf32>
    %cst_29 = arith.constant dense<0xFF800000> : vector<64xf32>
    %58 = vector.multi_reduction <maximumf>, %57, %cst_29 [1] : vector<64x64xf32> to vector<64xf32>
    %59 = vector.shape_cast %58 : vector<64xf32> to vector<64x1xf32>
    %60 = vector.broadcast %59 : vector<64x1xf32> to vector<64x64xf32>
    %61 = arith.subf %57, %60 : vector<64x64xf32>
    %62 = math.exp %61 : vector<64x64xf32>
    %cst_30 = arith.constant 0.000000e+00 : f32
    %63 = vector.broadcast %cst_30 : f32 to vector<64x64xf32>
    %64 = arith.select %5, %62, %63 : vector<64x64xi1>, vector<64x64xf32>
    %cst_31 = arith.constant dense<0.000000e+00> : vector<64xf32>
    %65 = vector.multi_reduction <add>, %64, %cst_31 [1] : vector<64x64xf32> to vector<64xf32>
    %66 = vector.shape_cast %65 : vector<64xf32> to vector<64x1xf32>
    %cst_32 = arith.constant 9.99999996E-13 : f32
    %67 = vector.broadcast %cst_32 : f32 to vector<64x1xf32>
    %68 = arith.maximumf %66, %67 : vector<64x1xf32>
    %69 = tpu.reciprocal %68 {approx = true} : vector<64x1xf32> -> vector<64x1xf32>
    %70 = vector.broadcast %69 : vector<64x1xf32> to vector<64x64xf32>
    %71 = arith.mulf %64, %70 : vector<64x64xf32>
    %72 = arith.truncf %71 : vector<64x64xf32> to vector<64x64xbf16>
    %73 = vector.extract_strided_slice %16 {offsets = [0, 2], sizes = [64, 1], strides = [1, 1]} : vector<64x4xf32> to vector<64x1xf32>
    %74 = vector.extract_strided_slice %18 {offsets = [2, 0], sizes = [1, 64], strides = [1, 1]} : vector<4x64xf32> to vector<1x64xf32>
    %75 = vector.broadcast %73 : vector<64x1xf32> to vector<64x64xf32>
    %76 = vector.broadcast %74 : vector<1x64xf32> to vector<64x64xf32>
    %77 = arith.addf %75, %76 : vector<64x64xf32>
    %cst_33 = arith.constant 0.000000e+00 : f32
    %78 = vector.broadcast %cst_33 : f32 to vector<64x64xf32>
    %79 = arith.cmpf ogt, %77, %78 : vector<64x64xf32>
    %cst_34 = arith.constant 2.000000e-01 : f32
    %80 = vector.broadcast %cst_34 : f32 to vector<64x64xf32>
    %81 = arith.mulf %80, %77 : vector<64x64xf32>
    %82 = arith.select %79, %77, %81 : vector<64x64xi1>, vector<64x64xf32>
    %cst_35 = arith.constant -1.000000e+30 : f32
    %83 = vector.broadcast %cst_35 : f32 to vector<64x64xf32>
    %84 = arith.select %5, %82, %83 : vector<64x64xi1>, vector<64x64xf32>
    %cst_36 = arith.constant dense<0xFF800000> : vector<64xf32>
    %85 = vector.multi_reduction <maximumf>, %84, %cst_36 [1] : vector<64x64xf32> to vector<64xf32>
    %86 = vector.shape_cast %85 : vector<64xf32> to vector<64x1xf32>
    %87 = vector.broadcast %86 : vector<64x1xf32> to vector<64x64xf32>
    %88 = arith.subf %84, %87 : vector<64x64xf32>
    %89 = math.exp %88 : vector<64x64xf32>
    %cst_37 = arith.constant 0.000000e+00 : f32
    %90 = vector.broadcast %cst_37 : f32 to vector<64x64xf32>
    %91 = arith.select %5, %89, %90 : vector<64x64xi1>, vector<64x64xf32>
    %cst_38 = arith.constant dense<0.000000e+00> : vector<64xf32>
    %92 = vector.multi_reduction <add>, %91, %cst_38 [1] : vector<64x64xf32> to vector<64xf32>
    %93 = vector.shape_cast %92 : vector<64xf32> to vector<64x1xf32>
    %cst_39 = arith.constant 9.99999996E-13 : f32
    %94 = vector.broadcast %cst_39 : f32 to vector<64x1xf32>
    %95 = arith.maximumf %93, %94 : vector<64x1xf32>
    %96 = tpu.reciprocal %95 {approx = true} : vector<64x1xf32> -> vector<64x1xf32>
    %97 = vector.broadcast %96 : vector<64x1xf32> to vector<64x64xf32>
    %98 = arith.mulf %91, %97 : vector<64x64xf32>
    %99 = arith.truncf %98 : vector<64x64xf32> to vector<64x64xbf16>
    %100 = vector.extract_strided_slice %16 {offsets = [0, 3], sizes = [64, 1], strides = [1, 1]} : vector<64x4xf32> to vector<64x1xf32>
    %101 = vector.extract_strided_slice %18 {offsets = [3, 0], sizes = [1, 64], strides = [1, 1]} : vector<4x64xf32> to vector<1x64xf32>
    %102 = vector.broadcast %100 : vector<64x1xf32> to vector<64x64xf32>
    %103 = vector.broadcast %101 : vector<1x64xf32> to vector<64x64xf32>
    %104 = arith.addf %102, %103 : vector<64x64xf32>
    %cst_40 = arith.constant 0.000000e+00 : f32
    %105 = vector.broadcast %cst_40 : f32 to vector<64x64xf32>
    %106 = arith.cmpf ogt, %104, %105 : vector<64x64xf32>
    %cst_41 = arith.constant 2.000000e-01 : f32
    %107 = vector.broadcast %cst_41 : f32 to vector<64x64xf32>
    %108 = arith.mulf %107, %104 : vector<64x64xf32>
    %109 = arith.select %106, %104, %108 : vector<64x64xi1>, vector<64x64xf32>
    %cst_42 = arith.constant -1.000000e+30 : f32
    %110 = vector.broadcast %cst_42 : f32 to vector<64x64xf32>
    %111 = arith.select %5, %109, %110 : vector<64x64xi1>, vector<64x64xf32>
    %cst_43 = arith.constant dense<0xFF800000> : vector<64xf32>
    %112 = vector.multi_reduction <maximumf>, %111, %cst_43 [1] : vector<64x64xf32> to vector<64xf32>
    %113 = vector.shape_cast %112 : vector<64xf32> to vector<64x1xf32>
    %114 = vector.broadcast %113 : vector<64x1xf32> to vector<64x64xf32>
    %115 = arith.subf %111, %114 : vector<64x64xf32>
    %116 = math.exp %115 : vector<64x64xf32>
    %cst_44 = arith.constant 0.000000e+00 : f32
    %117 = vector.broadcast %cst_44 : f32 to vector<64x64xf32>
    %118 = arith.select %5, %116, %117 : vector<64x64xi1>, vector<64x64xf32>
    %cst_45 = arith.constant dense<0.000000e+00> : vector<64xf32>
    %119 = vector.multi_reduction <add>, %118, %cst_45 [1] : vector<64x64xf32> to vector<64xf32>
    %120 = vector.shape_cast %119 : vector<64xf32> to vector<64x1xf32>
    %cst_46 = arith.constant 9.99999996E-13 : f32
    %121 = vector.broadcast %cst_46 : f32 to vector<64x1xf32>
    %122 = arith.maximumf %120, %121 : vector<64x1xf32>
    %123 = tpu.reciprocal %122 {approx = true} : vector<64x1xf32> -> vector<64x1xf32>
    %124 = vector.broadcast %123 : vector<64x1xf32> to vector<64x64xf32>
    %125 = arith.mulf %118, %124 : vector<64x64xf32>
    %126 = arith.truncf %125 : vector<64x64xf32> to vector<64x64xbf16>
    %127 = tpu.concatenate %45, %72, %99, %126 in 1 : vector<64x64xbf16>, vector<64x64xbf16>, vector<64x64xbf16>, vector<64x64xbf16> -> vector<64x256xbf16>
    %128 = vector.shape_cast %14 : vector<64x128xbf16> to vector<1x64x128xbf16>
    %129 = vector.shape_cast %128 : vector<1x64x128xbf16> to vector<1x64x128xbf16>
    %130 = vector.broadcast %129 : vector<1x64x128xbf16> to vector<4x64x128xbf16>
    %131 = vector.shape_cast %130 : vector<4x64x128xbf16> to vector<256x128xbf16>
    %c0_47 = arith.constant 0 : index
    %c0_48 = arith.constant 0 : index
    %132 = vector.load %arg8[%c0_47, %c0_48] : memref<256x128xbf16, #tpu.memory_space<vmem>>, vector<256x128xbf16>
    %133 = arith.mulf %131, %132 : vector<256x128xbf16>
    %cst_49 = arith.constant dense<0.000000e+00> : vector<64x128xf32>
    %134 = tpu.matmul %127, %133, %cst_49 {dimension_numbers = #tpu.dot_dimension_numbers<[1], [0], [0], [1], [0, 0, 1, 1], [], []>} : vector<64x256xbf16>, vector<256x128xbf16>, vector<64x128xf32> -> vector<64x128xf32>
    %c0_50 = arith.constant 0 : index
    %c0_51 = arith.constant 0 : index
    %135 = vector.load %arg9[%c0_50, %c0_51] : memref<1x128xf32, #tpu.memory_space<vmem>>, vector<1x128xf32>
    %136 = vector.broadcast %135 : vector<1x128xf32> to vector<64x128xf32>
    %137 = arith.addf %134, %136 : vector<64x128xf32>
    %cst_52 = arith.constant 0.000000e+00 : f32
    %138 = vector.broadcast %cst_52 : f32 to vector<64x128xf32>
    %139 = arith.cmpf ogt, %137, %138 : vector<64x128xf32>
    %cst_53 = arith.constant 0.00999999977 : f32
    %140 = vector.broadcast %cst_53 : f32 to vector<64x128xf32>
    %141 = arith.mulf %140, %137 : vector<64x128xf32>
    %142 = arith.select %139, %137, %141 : vector<64x128xi1>, vector<64x128xf32>
    %143 = vector.extract_strided_slice %142 {offsets = [0, 0], sizes = [64, 32], strides = [1, 1]} : vector<64x128xf32> to vector<64x32xf32>
    %144 = vector.extract_strided_slice %142 {offsets = [0, 32], sizes = [64, 32], strides = [1, 1]} : vector<64x128xf32> to vector<64x32xf32>
    %145 = arith.addf %143, %144 : vector<64x32xf32>
    %146 = vector.extract_strided_slice %142 {offsets = [0, 64], sizes = [64, 32], strides = [1, 1]} : vector<64x128xf32> to vector<64x32xf32>
    %147 = arith.addf %145, %146 : vector<64x32xf32>
    %148 = vector.extract_strided_slice %142 {offsets = [0, 96], sizes = [64, 32], strides = [1, 1]} : vector<64x128xf32> to vector<64x32xf32>
    %149 = arith.addf %147, %148 : vector<64x32xf32>
    %cst_54 = arith.constant 2.500000e-01 : f32
    %150 = vector.broadcast %cst_54 : f32 to vector<64x32xf32>
    %151 = arith.mulf %149, %150 : vector<64x32xf32>
    %cst_55 = arith.constant dense<0.000000e+00> : vector<32xf32>
    %152 = vector.multi_reduction <add>, %151, %cst_55 [0] : vector<64x32xf32> to vector<32xf32>
    %153 = vector.shape_cast %152 : vector<32xf32> to vector<1x32xf32>
    %cst_56 = arith.constant 1.562500e-02 : f32
    %154 = vector.broadcast %cst_56 : f32 to vector<1x32xf32>
    %155 = arith.mulf %153, %154 : vector<1x32xf32>
    %c0_57 = arith.constant 0 : index
    %c0_58 = arith.constant 0 : index
    %156 = vector.load %arg10[%c0_57, %c0_58] : memref<32x2xf32, #tpu.memory_space<vmem>>, vector<32x2xf32>
    %cst_59 = arith.constant dense<0.000000e+00> : vector<1x2xf32>
    %157 = tpu.matmul %155, %156, %cst_59 {dimension_numbers = #tpu.dot_dimension_numbers<[1], [0], [0], [1], [0, 0, 1, 1], [], []>} : vector<1x32xf32>, vector<32x2xf32>, vector<1x2xf32> -> vector<1x2xf32>
    %c0_60 = arith.constant 0 : index
    %c0_61 = arith.constant 0 : index
    %158 = vector.load %arg11[%c0_60, %c0_61] : memref<1x2xf32, #tpu.memory_space<vmem>>, vector<1x2xf32>
    %159 = arith.addf %157, %158 : vector<1x2xf32>
    %c0_62 = arith.constant 0 : index
    %c0_63 = arith.constant 0 : index
    %c0_64 = arith.constant 0 : index
    %160 = vector.load %arg12[%c0_62, %c0_63, %c0_64] : memref<1x1x2xf32, #tpu.memory_space<vmem>>, vector<1x1x2xf32>
    %161 = vector.shape_cast %160 : vector<1x1x2xf32> to vector<1x2xf32>
    %162 = vector.shape_cast %159 : vector<1x2xf32> to vector<1x1x2xf32>
    tpu.vector_store %arg12[%c0_62, %c0_63, %c0_64], %162 {strides = array<i32>} : memref<1x1x2xf32, #tpu.memory_space<vmem>>, vector<1x1x2xf32>,
    return
  }
  func.func @transform_0(%arg0: i32) -> (i32, i32, i32) {
    %c0_i32 = arith.constant 0 : i32
    %c0_i32_0 = arith.constant 0 : i32
    %c0_i32_1 = arith.constant 0 : i32
    return %arg0, %c0_i32, %c0_i32_0 : i32, i32, i32
  }
  func.func @transform_1(%arg0: i32) -> (i32, i32, i32) {
    %c0_i32 = arith.constant 0 : i32
    %c0_i32_0 = arith.constant 0 : i32
    %c0_i32_1 = arith.constant 0 : i32
    return %arg0, %c0_i32, %c0_i32_0 : i32, i32, i32
  }
  func.func @transform_2(%arg0: i32) -> (i32, i32) {
    %c0_i32 = arith.constant 0 : i32
    %c0_i32_0 = arith.constant 0 : i32
    %c0_i32_1 = arith.constant 0 : i32
    return %c0_i32, %c0_i32_0 : i32, i32
  }
  func.func @transform_3(%arg0: i32) -> (i32, i32) {
    %c0_i32 = arith.constant 0 : i32
    %c0_i32_0 = arith.constant 0 : i32
    %c0_i32_1 = arith.constant 0 : i32
    return %c0_i32, %c0_i32_0 : i32, i32
  }
  func.func @transform_4(%arg0: i32) -> (i32, i32) {
    %c0_i32 = arith.constant 0 : i32
    %c0_i32_0 = arith.constant 0 : i32
    %c0_i32_1 = arith.constant 0 : i32
    return %c0_i32, %c0_i32_0 : i32, i32
  }
  func.func @transform_5(%arg0: i32) -> (i32, i32) {
    %c0_i32 = arith.constant 0 : i32
    %c0_i32_0 = arith.constant 0 : i32
    %c0_i32_1 = arith.constant 0 : i32
    return %c0_i32, %c0_i32_0 : i32, i32
  }
  func.func @transform_6(%arg0: i32) -> (i32, i32) {
    %c0_i32 = arith.constant 0 : i32
    %c0_i32_0 = arith.constant 0 : i32
    %c0_i32_1 = arith.constant 0 : i32
    return %c0_i32, %c0_i32_0 : i32, i32
  }
  func.func @transform_7(%arg0: i32) -> (i32, i32) {
    %c0_i32 = arith.constant 0 : i32
    %c0_i32_0 = arith.constant 0 : i32
    %c0_i32_1 = arith.constant 0 : i32
    return %c0_i32, %c0_i32_0 : i32, i32
  }
  func.func @transform_8(%arg0: i32) -> (i32, i32) {
    %c0_i32 = arith.constant 0 : i32
    %c0_i32_0 = arith.constant 0 : i32
    %c0_i32_1 = arith.constant 0 : i32
    return %c0_i32, %c0_i32_0 : i32, i32
  }
  func.func @transform_9(%arg0: i32) -> (i32, i32) {
    %c0_i32 = arith.constant 0 : i32
    %c0_i32_0 = arith.constant 0 : i32
    %c0_i32_1 = arith.constant 0 : i32
    return %c0_i32, %c0_i32_0 : i32, i32
  }
  func.func @transform_10(%arg0: i32) -> (i32, i32) {
    %c0_i32 = arith.constant 0 : i32
    %c0_i32_0 = arith.constant 0 : i32
    %c0_i32_1 = arith.constant 0 : i32
    return %c0_i32, %c0_i32_0 : i32, i32
  }
  func.func @transform_11(%arg0: i32) -> (i32, i32, i32) {
    %c0_i32 = arith.constant 0 : i32
    %c0_i32_0 = arith.constant 0 : i32
    %c0_i32_1 = arith.constant 0 : i32
    return %arg0, %c0_i32, %c0_i32_0 : i32, i32, i32
  }
}

</mosaic_0001>

<bundles_post_ra>
// kernel: gat_forward.1
= control target key start
LH: loop header
LB: loop body
LE: loop exit
PB: predicated region body
PF: predicated region fallthrough
CT: control target
= control target key end

     0   :  { %s3595_s0 = inlined_call_operand.vmem [shape: bf16[2,64,32], index: 0, kind: input, shape index: {}]   ;;  %s3596_s1 = inlined_call_operand.vmem [shape: bf16[2,64,64], index: 1, kind: input, shape index: {}]   ;;  %s3597_s2 = inlined_call_operand.vmem [shape: bf16[32,32], index: 2, kind: input, shape index: {}]   ;;  %s3598_s3 = inlined_call_operand.vmem [shape: f32[1,32], index: 3, kind: input, shape index: {}]   ;;  %s3599_s4 = inlined_call_operand.vmem [shape: bf16[32,128], index: 4, kind: input, shape index: {}]   ;;  %s3600_s5 = inlined_call_operand.vmem [shape: bf16[4,128], index: 5, kind: input, shape index: {}]   ;;  %s3601_s6 = inlined_call_operand.vmem [shape: bf16[4,128], index: 6, kind: input, shape index: {}]   ;;  %s3602_s7 = inlined_call_operand.vmem [shape: bf16[256,128], index: 7, kind: input, shape index: {}]   ;;  %s3603_s8 = inlined_call_operand.vmem [shape: f32[1,128], index: 8, kind: input, shape index: {}]   ;;  %s3604_s9 = inlined_call_operand.vmem [shape: f32[32,2], index: 9, kind: input, shape index: {}]   ;;  %s3605_s10 = inlined_call_operand.vmem [shape: f32[1,2], index: 10, kind: input, shape index: {}]   ;;  %s3606_s11 = inlined_call_operand.hbm [shape: f32[2,1,2], index: 11, kind: output, shape index: {}]  }
   0x1   :  { %3607 = sst [smem:[#allocation5_spill]] %s3595_s0 }
   0x2   :  { %16 = vsyncpa [#allocation3], 0 }
   0x3   :  { %18 = vsyncpa [#allocation3 + $0x1], 0  ;;  %s2662_s17 = smov 0   ;;  %s2664_s18 = smov 0  }
   0x4   :  { %s2666_s19 = smov 0   ;;  %s2668_s20 = smov 0  }
   0x5 LB: > { %s2683_s21 = sadd.s32 4294967295, %s2589_s20   ;;  %s2119_s22 = sadd.s32 4294967294, %s2589_s20   ;;  %s2589_s20 = sphi %s2668_s20, %s3630_s20   ;;  %s2585_s19 = sphi %s2666_s19, %s3629_s19   ;;  %s2581_s18 = sphi %s2664_s18, %s3628_s18   ;;  %s2577_s17 = sphi %s2662_s17, %s3627_s17  }
   0x6   : > { %s2687_s23 = sadd.s32 1, %s2589_s20   ;;  %s272_s24 = sadd.s32 1, %s2585_s19 }
   0x7   : > { %s269_s25 = ssub.s32 %s2589_s20, %s2687_s23  ;;  %p282_p0 = scmp.ne.s32.totalorder %s2585_s19, %s2581_s18 }
   0x8   : > { %p270_p1 = scmp.eq.s32.totalorder %s269_s25, 0  ;;  %p283_p2 = scmp.eq.s32.totalorder %s2683_s21, 1 }
   0x9   : > { %p288_p3 = scmp.ne.s32.totalorder %s2581_s18, %s2577_s17  ;;  %p289_p4 = scmp.eq.s32.totalorder %s2119_s22, 1 }
   0xa   : > { %s2698_s26 = scalar_select %p270_p1, %s2585_s19, %s272_s24  }
   0xb   : > { %p2700_p5 = por %p283_p2, %p282_p0  ;;  %p2704_p6 = por %p289_p4, %p288_p3 }
   0xc   : > { %p2122_p7 = scmp.ge.s32.totalorder %s2589_s20, 1  ;;  %p350_p8 = scmp.lt.s32.totalorder %s2589_s20, 3 }
   0xe   : > { %p351_p9 = pnand %p2122_p7, %p350_p8 }
   0xf   : > { %v2375_v0 = vld [vmem:[%s3597_s2] sm:$0xff] (!%p351_p9)   ;;  %p394_p10 = scmp.lt.s32.totalorder (!%p351_p9), %s2683_s21, 1  ;;  %v2376_v1 = vld [vmem:[%s3597_s2 + $0x8] sm:$0xff] (!%p351_p9)   ;;  %vm474_vm0 = vcmask (!%p351_p9), 261120   ;;  %s3610_s0 = sld [smem:[#allocation5_spill]] (!%p351_p9)  ;;  %v2591_v30 = vmov (!%p351_p9), 0.0  }
  0x10   : > { %354 = sbr.rel (%p351_p9) target bundleno = 1991 (0x7c7), region = 64  ;;  %2234 = vmatprep.subr.bf16.mxu1 (!%p351_p9), %v2375_v0  ;;  %v2381_v2 = vld [vmem:[%s3599_s4] sm:$0xff] (!%p351_p9)   ;;  %v2382_v7 = vld [vmem:[%s3599_s4 + $0x8] sm:$0xff] (!%p351_p9)   ;;  %vm2592_vm1 = vmmov (!%p351_p9), 0   ;;  %v2593_v31 = vmov (!%p351_p9), 3   ;;  %v2387_v48 = vld [vmem:[%s3602_s7 + $0x50] sm:$0xff] (!%p351_p9)  }
  0x11   : > { %2235 = vmatpush3.bf16.msra.mxu1 (!%p351_p9), %v2375_v0  ;;  %v653_v8 = vld [vmem:[%s3601_s6] sm:$0x3] (!%p351_p9)  ;;  %2346 = vset.pattern.permute.xlu0 (!%p351_p9), %v2593_v31  ;;  %v2385_v40 = vld [vmem:[%s3602_s7 + $0x48] sm:$0xff] (!%p351_p9)   ;;  %v2388_v49 = vld [vmem:[%s3602_s7 + $0x10] sm:$0xff] (!%p351_p9)   ;;  %vm868_vm6 = vcmask (!%p351_p9), 523264   ;;  %s2598_s22 = smov (!%p351_p9), 96  }
  0x12   : > { %2236 = vmatprep.subr.bf16.mxu1 (!%p351_p9), %v2376_v1  ;;  %2258 = vmatprep.subr.bf16.mxu0 (!%p351_p9), %v653_v8  ;;  %v2127_v10 = vld [vmem:[%s3598_s3] ss:$0 sm:$0xff] (!%p351_p9)  ;;  %v2386_v43 = vld [vmem:[%s3602_s7 + $0x8] sm:$0xff] (!%p351_p9)   ;;  %v2389_v50 = vld [vmem:[%s3602_s7 + $0x58] sm:$0xff] (!%p351_p9)   ;;  %s2599_s24 = smov (!%p351_p9), 32  }
  0x13   : > { %2259 = vmatpush3.bf16.xpose.msra.mxu0 (!%p351_p9), %v653_v8  ;;  %v2383_v35 = vld [vmem:[%s3602_s7 + $0x40] sm:$0xff] (!%p351_p9)   ;;  %v2390_v55 = vld [vmem:[%s3602_s7 + $0x18] sm:$0xff] (!%p351_p9)   ;;  %v2393_v63 = vld [vmem:[%s3602_s7 + $0x68] sm:$0xff] (!%p351_p9)  }
  0x14   : > { %v2384_v36 = vld [vmem:[%s3602_s7] sm:$0xff] (!%p351_p9)   ;;  %v2395_v0 = vld [vmem:[%s3602_s7 + $0x70] sm:$0xff] (!%p351_p9)  }
  0x15   : > { %2237 = vmatpush3.bf16.msra.mxu1 (!%p351_p9), %v2376_v1  ;;  %v2391_v59 = vld [vmem:[%s3602_s7 + $0x60] sm:$0xff] (!%p351_p9)  }
  0x16   : > { %2246 = vmatprep.subr.bf16.mxu1 (!%p351_p9), %v2381_v2  ;;  %v2392_v61 = vld [vmem:[%s3602_s7 + $0x20] sm:$0xff] (!%p351_p9)  }
  0x17   : > { %s2718_s14 = scalar_select %p394_p10, %s2683_s21, 1 }
  0x19   : > { %s2165_s15 = sshll.u32 %s2718_s14, 5  ;;  %s2597_s14 = smov 64  }
  0x1a   : > { %s398_s29 = scalar_lea.vmem %s3610_s0, %s2165_s15  ;;  %s2843_s13 = scalar_lea.vmem %s3596_s1, %s2165_s15 }
  0x1b   : > { %v2377_v3 = vld [vmem:[%s398_s29] sm:$0xff]   ;;  %v2378_v4 = vld [vmem:[%s398_s29 + $0x8] sm:$0xff]   ;;  %v2379_v5 = vld [vmem:[%s398_s29 + $0x10] sm:$0xff]  }
  0x1c   : > { %2238 = vmatprep.mubr.msk.bf16.mxu1 %vm474_vm0, %v2377_v3  ;;  %v2380_v6 = vld [vmem:[%s398_s29 + $0x18] sm:$0xff]   ;;  %s2162_s29 = sshll.u32 %s2683_s21, 4  ;;  %s2601_s21 = smov [#allocation2]  }
  0x1d   : > { %2239 = vmatmul.mubr.msk.bf16.vlgmr.msra.gmra.mrb[0].mxu1 %vm474_vm0, %v2378_v4  ;;  %v2396_v4 = vld [vmem:[%s3602_s7 + $0x30] sm:$0xff]   ;;  %s2531_s25 = sshll.u32 %s2601_s21, 4  ;;  %s2532_s25 = int_to_ptr.vmem [resolvable:$false] %s2531_s25 }
  0x1e   : > { %2242 = vmatprep.mubr.msk.bf16.mxu1 %vm474_vm0, %v2379_v5  ;;  %2247 = vmatpush3.bf16.msra.mxu1 %v2381_v2  ;;  %v2394_v2 = vld [vmem:[%s3602_s7 + $0x28] sm:$0xff]   ;;  %s2533_s0 = scalar_lea.vmem %s2532_s25, 32 }
  0x1f   : > { %2248 = vmatprep.subr.bf16.mxu1 %v2382_v7 }
  0x22   : > { %2249 = vmatpush3.bf16.msra.mxu1 %v2382_v7 }
  0x23   : > { %2268 = vmatprep.subr.bf16.mxu1 %v2591_v30 }
  0x25   : > { %2243 = vmatmul.mubr.msk.bf16.gmra.mrb[4].mxu1 %vm474_vm0, %v2380_v6  ;;  %v2397_v6 = vld [vmem:[%s3602_s7 + $0x78] sm:$0xff]  }
  0xf0   : > { %v2240_v9 = vpop.f32.mrb[0].mxu1 }
  0xf1   : > { %v521_v11 = vpop.f32.mrb[1].mxu1  ;;  %v530_v13 = vadd.f32 %v2240_v9, %v2127_v10  ;;  %v2398_v9 = vld [vmem:[%s3602_s7 + $0x38] sm:$0xff]  }
  0xf2   : > { %v2241_v12 = vpop.f32.mrb[2].mxu1  ;;  %v522_v16 = vadd.f32 %v2127_v10, %v521_v11 }
  0xf3   : > { %v533_v14 = vadd.f32 %v2241_v12, %v2127_v10  ;;  %v524_v15 = vpop.f32.mrb[3].mxu1  ;;  %v719_v12 = vld [vmem:[%s3600_s5] sm:$0x3] }
  0xf4   : > { %v525_v17 = vadd.f32 %v2127_v10, %v524_v15 }
  0xf5   : > { %v553_v18 = vpack.c.bf16 %v533_v14, %v530_v13  ;;  %v2594_v13 = vmov 1  }
  0xf6   : > { %v552_v19 = vpack.c.bf16 %v525_v17, %v522_v16  ;;  %2351 = vset.pattern.permute.xlu1 %v2594_v13 }
  0xf8   : > { %v2244_v20 = vpop.f32.mrb[4].mxu1  ;;  %2250 = vmatprep.mubr.msk.bf16.mxu1 %vm474_vm0, %v552_v19 }
  0xf9   : > { %v546_v21 = vadd.f32 %v2244_v20, %v2127_v10  ;;  %v537_v22 = vpop.f32.mrb[5].mxu1  ;;  %2251 = vmatmul.mubr.msk.bf16.vlgmr.msra.gmra.mrb[8].mxu1 %vm474_vm0, %v553_v18  ;;  %v2595_v18 = vmov 2  }
  0xfa   : > { %v538_v23 = vadd.f32 %v2127_v10, %v537_v22  ;;  %v2245_v24 = vpop.f32.mrb[6].mxu1  ;;  %v2596_v22 = vmov 0  }
  0xfb   : > { %v549_v25 = vadd.f32 %v2245_v24, %v2127_v10  ;;  %v540_v26 = vpop.f32.mrb[7].mxu1  ;;  %v800_v24 = vlaneseq }
  0xfc   : > { %v541_v27 = vadd.f32 %v2127_v10, %v540_v26 }
  0xfd   : > { %v555_v28 = vpack.c.bf16 %v549_v25, %v546_v21  ;;  %v801_v25 = vshrl.u32 %v800_v24, 7 }
  0xfe   : > { %v554_v29 = vpack.c.bf16 %v541_v27, %v538_v23 }
  0xff   : > { %v802_v26 = vsub.s32 0, %v801_v25  ;;  %v1195_v27 = vsub.s32 2, %v801_v25 }
 0x100   : > { %2254 = vmatprep.mubr.msk.bf16.mxu1 %vm474_vm0, %v554_v29 }
 0x101   : > { %2255 = vmatmul.mubr.msk.bf16.gmra.mrb[12].mxu1 %vm474_vm0, %v555_v28 }
 0x102   : > { %2276 = vmatprep.mubr.msk.bf16.mxu1 %vm2592_vm1, %v2591_v30 }
 0x1cc   : > { %v2252_v32 = vpop.f32.mrb[8].mxu1 }
 0x1cd   : > { %v618_v33 = vpop.f32.mrb[9].mxu1 }
 0x1ce   : > { %v2253_v34 = vpop.f32.mrb[10].mxu1 }
 0x1cf   : > { %v650_v37 = vpack.c.bf16 %v2253_v34, %v2252_v32  ;;  %v621_v38 = vpop.f32.mrb[11].mxu1 }
 0x1d0   : > { %v649_v39 = vpack.c.bf16 %v621_v38, %v618_v33  ;;  %v1011_v38 = vsub.s32 1, %v801_v25 }
 0x1d1   : > { %v1722_v45 = vmul.bf16 %v2385_v40, %v650_v37  ;;  %v1714_v53 = vmul.bf16 %v2386_v43, %v650_v37  ;;  %v1726_v3 = vmul.bf16 %v2393_v63, %v650_v37  ;;  %v1718_v7 = vmul.bf16 %v2394_v2, %v650_v37 }
 0x1d2   : > { %2260 = vmatprep.mubr.bf16.mxu0 %v649_v39  ;;  %2269 = vmatpush3.bf16.xpose.msra.mxu1 %v649_v39  ;;  %v1721_v41 = vmul.bf16 %v2383_v35, %v649_v39  ;;  %v1713_v42 = vmul.bf16 %v2384_v36, %v649_v39  ;;  %v1725_v62 = vmul.bf16 %v2391_v59, %v649_v39  ;;  %v417_v35 = vld [vmem:[%s2843_s13 + $0x8] sm:$0xf]  ;;  %v415_v36 = vld [vmem:[%s2843_s13] sm:$0xf]  ;;  %v418_v59 = vld [vmem:[%s2843_s13 + $0xc] sm:$0xf] }
 0x1d3   : > { %2261 = vmatmul.mubr.bf16.vlgmr.msra.gmra.mrb[0].mxu0 %v650_v37  ;;  %2270 = vmatprep.subr.bf16.mxu1 %v2591_v30  ;;  %v1717_v1 = vmul.bf16 %v2392_v61, %v649_v39  ;;  %vm425_vm2 = vcmp.gt.bf16.partialorder %v417_v35, 0  ;;  %vm423_vm3 = vcmp.gt.bf16.partialorder %v415_v36, 0  ;;  %vm426_vm10 = vcmp.gt.bf16.partialorder %v418_v59, 0 }
 0x1d4   : > { %v2256_v44 = vpop.f32.mrb[12].mxu1  ;;  %2189 = vmatprep.subr.bf16.mxu0 %v1721_v41  ;;  %v838_v39 = vsel %vm425_vm2, 65537, %v2596_v22  ;;  %v836_v41 = vsel %vm423_vm3, 65537, %v2596_v22 }
 0x1d5   : > { %v634_v46 = vpop.f32.mrb[13].mxu1  ;;  %2190 = vmatpush3.bf16.msra.mxu0 %v1713_v42  ;;  %v846_v43 = vunpack.c.l.b16 %v838_v39 }
 0x1d6   : > { %v2257_v47 = vpop.f32.mrb[14].mxu1  ;;  %2191 = vmatprep.subr.bf16.mxu0 %v1722_v45  ;;  %v844_v45 = vunpack.c.l.b16 %v836_v41 }
 0x1d7   : > { %v652_v51 = vpack.c.bf16 %v2257_v47, %v2256_v44  ;;  %v637_v52 = vpop.f32.mrb[15].mxu1  ;;  %vm2855_vm4 = vcmp.ne.s32.totalorder %v846_v43, 0 }
 0x1d8   : > { %v651_v54 = vpack.c.bf16 %v637_v52, %v634_v46  ;;  %vm2859_vm7 = vcmp.ne.s32.totalorder %v844_v45, 0 }
 0x1d9   : > { %2192 = vmatpush3.bf16.msra.mxu0 %v1714_v53  ;;  %v1724_v58 = vmul.bf16 %v2389_v50, %v652_v51  ;;  %v1716_v60 = vmul.bf16 %v2390_v55, %v652_v51  ;;  %v1728_v10 = vmul.bf16 %v2397_v6, %v652_v51  ;;  %v1720_v11 = vmul.bf16 %v2398_v9, %v652_v51  ;;  %v416_v6 = vld [vmem:[%s2843_s13 + $0x4] sm:$0xf] }
 0x1da   : > { %2271 = vmatpush3.bf16.xpose.msra.mxu1 %v650_v37  ;;  %v1723_v56 = vmul.bf16 %v2387_v48, %v651_v54  ;;  %v1715_v57 = vmul.bf16 %v2388_v49, %v651_v54  ;;  %2264 = vmatprep.mubr.bf16.mxu0 %v651_v54  ;;  %v1727_v5 = vmul.bf16 %v2395_v0, %v651_v54  ;;  %v1379_v37 = vsub.s32 3, %v801_v25 }
 0x1db   : > { %2265 = vmatmul.mubr.bf16.gmra.mrb[4].mxu0 %v652_v51  ;;  %2272 = vmatprep.subr.bf16.mxu1 %v2591_v30  ;;  %v1719_v8 = vmul.bf16 %v2396_v4, %v651_v54  ;;  %vm424_vm11 = vcmp.gt.bf16.partialorder %v416_v6, 0  ;;  %v421_v6 = vld [vmem:[%s2843_s13 + $0x18] sm:$0xf] }
 0x1dc   : > { %2193 = vmatprep.subr.bf16.mxu0 %v1723_v56 }
 0x1dd   : > { %2194 = vmatpush3.bf16.msra.mxu0 %v1715_v57 }
 0x1de   : > { %2195 = vmatprep.subr.bf16.mxu0 %v1724_v58 }
 0x1e1   : > { %2196 = vmatpush3.bf16.msra.mxu0 %v1716_v60 }
 0x1e2   : > { %2197 = vmatprep.subr.bf16.mxu0 %v1725_v62  ;;  %2273 = vmatpush3.bf16.xpose.msra.mxu1 %v651_v54 }
 0x1e3   : > { %2274 = vmatprep.subr.bf16.mxu1 %v2591_v30 }
 0x1e5   : > { %2198 = vmatpush3.bf16.msra.mxu0 %v1717_v1 }
 0x1e6   : > { %2199 = vmatprep.subr.bf16.mxu0 %v1726_v3 }
 0x1e9   : > { %2200 = vmatpush3.bf16.msra.mxu0 %v1718_v7 }
 0x1ea   : > { %2201 = vmatprep.subr.bf16.mxu0 %v1727_v5  ;;  %2275 = vmatpush3.bf16.xpose.msra.mxu1 %v652_v51  ;;  %v839_v5 = vsel %vm426_vm10, 65537, %v2596_v22  ;;  %vm429_vm10 = vcmp.gt.bf16.partialorder %v421_v6, 0 }
 0x1ed   : > { %2202 = vmatpush3.bf16.msra.mxu0 %v1719_v8  ;;  %v847_v8 = vunpack.c.l.b16 %v839_v5 }
 0x1ee   : > { %2203 = vmatprep.subr.bf16.mxu0 %v1728_v10 }
 0x1ef   : > { %vm2894_vm12 = vcmp.ne.s32.totalorder %v847_v8, 0 }
 0x1f1   : > { %2204 = vmatpush3.bf16.msra.mxu0 %v1720_v11  ;;  %2277 = vmatmul.mubr.bf16.vlgmr.msra.gmra.mrb[16].mxu1 %v719_v12 }
 0x1f2   : > { %2288 = vmatprep.mubr.msk.f32.mxu1 %vm2592_vm1, %v2591_v30 }
 0x2a6   : > { %v2262_v14 = vpop.f32.mrb[0].mxu0 }
 0x2a7   : > { %1354 = vperm.xlu0 %2346, %v2262_v14   ;;  %v688_v15 = vpop.f32.mrb[1].mxu0 }
 0x2a8   : > { %978 = vperm.xlu1 %2351, %v688_v15   ;;  %v2263_v16 = vpop.f32.mrb[2].mxu0 }
 0x2a9   : > { %v691_v17 = vpop.f32.mrb[3].mxu0 }
 0x2ab   : > { %2347 = vset.pattern.permute.xlu0 %v2594_v13 }
 0x2ac   : > { %986 = vperm.xlu0 %2347, %v2262_v14   ;;  %2352 = vset.pattern.permute.xlu1 %v2595_v18 }
 0x2ad   : > { %1162 = vperm.xlu1 %2352, %v688_v15  }
 0x2ae   : > { %v2808_v19 = vpop.f32.mrb[4].mxu0 }
 0x2af   : > { %v704_v20 = vpop.f32.mrb[5].mxu0 }
 0x2b0   : > { %2348 = vset.pattern.permute.xlu0 %v2595_v18  ;;  %v2810_v21 = vpop.f32.mrb[6].mxu0 }
 0x2b1   : > { %1170 = vperm.xlu0 %2348, %v2262_v14   ;;  %2353 = vset.pattern.permute.xlu1 %v2596_v22  ;;  %v707_v23 = vpop.f32.mrb[7].mxu0 }
 0x2b2   : > { %762 = vperm.xlu1 %2353, %v688_v15  }
 0x2b5   : > { %2349 = vset.pattern.permute.xlu0 %v2596_v22 }
 0x2b6   : > { %772 = vperm.xlu0 %2349, %v2262_v14   ;;  %2354 = vset.pattern.permute.xlu1 %v2593_v31  ;;  %v837_v14 = vsel %vm424_vm11, 65537, %v2596_v22 }
 0x2b7   : > { %1358 = vperm.xlu1 %2354, %v2263_v16   ;;  %v845_v25 = vunpack.c.l.b16 %v837_v14 }
 0x2b9   : > { %vm2914_vm1 = vcmp.ne.s32.totalorder %v845_v25, 0 }
 0x2ba   : > { %2350 = vset.pattern.permute.xlu0 %v2593_v31 }
 0x2bb   : > { %1346 = vperm.xlu0 %2350, %v688_v15   ;;  %2355 = vset.pattern.permute.xlu1 %v2594_v13 }
 0x2bc   : > { %990 = vperm.xlu1 %2355, %v2263_v16  }
 0x2bf   : > { %1350 = vperm.xlu0 %2350, %v691_v17  }
 0x2c0   : > { %2356 = vset.pattern.permute.xlu1 %v2595_v18 }
 0x2c1   : > { %1174 = vperm.xlu1 %2356, %v2263_v16  }
 0x2c3   : > { %2359 = vset.pattern.permute.xlu0 %v2595_v18 }
 0x2c4   : > { %1166 = vperm.xlu0 %2359, %v691_v17   ;;  %v754_v28 = vpop.f32.mrb[16].mxu1 }
 0x2c5   : > { %2357 = vset.pattern.permute.xlu1 %v2596_v22  ;;  %v2818_v29 = vrot.slane %v754_v28, %v802_v26  ;;  %v2820_v30 = vrot.slane %v754_v28, %v1195_v27  ;;  %v2278_v32 = vpop.f32.mrb[17].mxu1  ;;  %v2848_v40 = vrot.slane %v754_v28, %v1379_v37  ;;  %v2851_v42 = vrot.slane %v754_v28, %v1011_v38 }
 0x2c6   : > { %777 = vperm.xlu1 %2357, %v2263_v16   ;;  %v757_v33 = vpop.f32.mrb[18].mxu1 }
 0x2c7   : > { %v2279_v34 = vpop.f32.mrb[19].mxu1 }
 0x2c8   : > { %2361 = vset.pattern.permute.xlu0 %v2593_v31 }
 0x2c9   : > { %1370 = vperm.xlu0 %2361, %v2808_v19  }
 0x2ca   : > { %2358 = vset.pattern.permute.xlu1 %v2594_v13 }
 0x2cb   : > { %982 = vperm.xlu1 %2358, %v691_v17  }
 0x2cd   : > { %2362 = vset.pattern.permute.xlu0 %v2594_v13 }
 0x2ce   : > { %1002 = vperm.xlu0 %2362, %v2808_v19  }
 0x2cf   : > { %2360 = vset.pattern.permute.xlu1 %v2596_v22 }
 0x2d0   : > { %767 = vperm.xlu1 %2360, %v691_v17  }
 0x2d2   : > { %2366 = vset.pattern.permute.xlu0 %v2595_v18 }
 0x2d3   : > { %1178 = vperm.xlu0 %2366, %v704_v20  }
 0x2d4   : > { %2363 = vset.pattern.permute.xlu1 %v2595_v18 }
 0x2d5   : > { %1186 = vperm.xlu1 %2363, %v2808_v19  }
 0x2d7   : > { %2370 = vset.pattern.permute.xlu0 %v2593_v31 }
 0x2d8   : > { %1366 = vperm.xlu0 %2370, %v707_v23  }
 0x2d9   : > { %2364 = vset.pattern.permute.xlu1 %v2593_v31 }
 0x2da   : > { %1362 = vperm.xlu1 %2364, %v704_v20  }
 0x2dc   : > { %2373 = vset.pattern.permute.xlu0 %v2595_v18 }
 0x2de   : > { %2365 = vset.pattern.permute.xlu1 %v2594_v13 }
 0x2df   : > { %994 = vperm.xlu1 %2365, %v704_v20  }
 0x2e3   : > { %2367 = vset.pattern.permute.xlu1 %v2596_v22 }
 0x2e4   : > { %782 = vperm.xlu1 %2367, %v704_v20  }
 0x2e8   : > { %2368 = vset.pattern.permute.xlu1 %v2593_v31 }
 0x2e9   : > { %1374 = vperm.xlu1 %2368, %v2810_v21  }
 0x2ed   : > { %2369 = vset.pattern.permute.xlu1 %v2594_v13 }
 0x2ee   : > { %1006 = vperm.xlu1 %2369, %v2810_v21  }
 0x2f2   : > { %998 = vperm.xlu1 %2369, %v707_v23  }
 0x2f6   : > { %2371 = vset.pattern.permute.xlu1 %v2595_v18 }
 0x2f7   : > { %1182 = vperm.xlu1 %2371, %v707_v23  }
 0x2fb   : > { %2372 = vset.pattern.permute.xlu1 %v2596_v22 }
 0x2fc   : > { %787 = vperm.xlu1 %2372, %v707_v23  }
 0x326   : > { %v1355_v44 = vpop.permute.xlu0 %1354 }
 0x327   : > { %v1383_v46 = vadd.f32 %v2848_v40, %v1355_v44  ;;  %v979_v47 = vpop.permute.xlu1 %978 }
 0x328   : > { %v1013_v48 = vadd.f32 %v2851_v42, %v979_v47 }
 0x329   : > { %v1399_v49 = vmul.f32 0.2, %v1383_v46  ;;  %vm1391_vm5 = vcmp.gt.f32.partialorder %v1383_v46, 0.0 }
 0x32a   : > { %v1029_v51 = vmul.f32 0.2, %v1013_v48  ;;  %vm1021_vm8 = vcmp.gt.f32.partialorder %v1013_v48, 0.0 }
 0x32b   : > { %v987_v53 = vpop.permute.xlu0 %986  ;;  %v1407_v54 = vsel %vm1391_vm5, %v1383_v46, %v1399_v49 }
 0x32c   : > { %v1015_v55 = vadd.f32 %v2851_v42, %v987_v53  ;;  %v2864_v56 = vpop.permute.xlu1 %1162  ;;  %v2868_v57 = vsel %vm2855_vm4, %v1407_v54, -1e+30  ;;  %v1037_v58 = vsel %vm1021_vm8, %v1013_v48, %v1029_v51 }
 0x32d   : > { %v1427_v60 = vsel %vm868_vm6, %v2868_v57, -inf  ;;  %v2875_v61 = vsel %vm2859_vm7, %v1037_v58, -1e+30  ;;  %v420_v58 = vld [vmem:[%s2843_s13 + $0x14] sm:$0xf] }
 0x32e   : > { %v1031_v62 = vmul.f32 0.2, %v1015_v55  ;;  %1428 = vmax.xlane.f32.xlu1 %v1427_v60  ;;  %v1053_v63 = vsel %vm868_vm6, %v2875_v61, -inf  ;;  %vm1023_vm9 = vcmp.gt.f32.partialorder %v1015_v55, 0.0  ;;  %vm428_vm3 = vcmp.gt.bf16.partialorder %v420_v58, 0 }
 0x32f   : > { %1054 = vmax.xlane.f32.xlu0 %v1053_v63  ;;  %v841_v63 = vsel %vm428_vm3, 65537, %v2596_v22 }
 0x330   : > { %v2879_v0 = vpop.permute.xlu0 %1170  ;;  %v1039_v1 = vsel %vm1023_vm9, %v1015_v55, %v1031_v62  ;;  %v849_v5 = vunpack.c.l.b16 %v841_v63 }
 0x331   : > { %v2881_v2 = vpop.permute.xlu1 %762  ;;  %v2885_v3 = vsel %vm2855_vm4, %v1039_v1, -1e+30  ;;  %v1199_v63 = vadd.f32 %v2820_v30, %v2879_v0 }
 0x332   : > { %v1059_v4 = vsel %vm868_vm6, %v2885_v3, -inf  ;;  %vm2954_vm11 = vcmp.ne.s32.totalorder %v849_v5, 0 }
 0x333   : > { %1060 = vmax.xlane.f32.xlu1 %v1059_v4  ;;  %v419_v4 = vld [vmem:[%s2843_s13 + $0x10] sm:$0xf]  ;;  %v1215_v6 = vmul.f32 0.2, %v1199_v63 }
 0x334   : > { %vm427_vm5 = vcmp.gt.bf16.partialorder %v419_v4, 0 }
 0x335   : > { %v2891_v7 = vpop.permute.xlu0 %772 }
 0x336   : > { %v1359_v9 = vpop.permute.xlu1 %1358 }
 0x337   : > { %v1384_v10 = vadd.f32 %v2848_v40, %v1359_v9 }
 0x339   : > { %v1400_v11 = vmul.f32 0.2, %v1384_v10  ;;  %vm1392_vm13 = vcmp.gt.f32.partialorder %v1384_v10, 0.0 }
 0x33a   : > { %v1347_v13 = vpop.permute.xlu0 %1346 }
 0x33b   : > { %v1381_v15 = vadd.f32 %v2848_v40, %v1347_v13  ;;  %v991_v16 = vpop.permute.xlu1 %990  ;;  %v1408_v17 = vsel %vm1392_vm13, %v1384_v10, %v1400_v11  ;;  %v840_v11 = vsel %vm427_vm5, 65537, %v2596_v22 }
 0x33c   : > { %v1016_v18 = vadd.f32 %v2851_v42, %v991_v16  ;;  %v2903_v20 = vsel %vm2894_vm12, %v1408_v17, -1e+30  ;;  %v842_v17 = vsel %vm429_vm10, 65537, %v2596_v22 }
 0x33d   : > { %v1397_v23 = vmul.f32 0.2, %v1381_v15  ;;  %v1430_v24 = vsel %vm868_vm6, %v2903_v20, -inf  ;;  %vm1389_vm14 = vcmp.gt.f32.partialorder %v1381_v15, 0.0 }
 0x33e   : > { %v1032_v26 = vmul.f32 0.2, %v1016_v18  ;;  %v1351_v27 = vpop.permute.xlu0 %1350  ;;  %1431 = vmax.xlane.f32.xlu0 %v1430_v24  ;;  %vm1024_vm15 = vcmp.gt.f32.partialorder %v1016_v18, 0.0 }
 0x33f   : > { %v1382_v28 = vadd.f32 %v2848_v40, %v1351_v27  ;;  %v1405_v32 = vsel %vm1389_vm14, %v1381_v15, %v1397_v23 }
 0x340   : > { %v2910_v33 = vsel %vm2859_vm7, %v1405_v32, -1e+30  ;;  %v1040_v34 = vsel %vm1024_vm15, %v1016_v18, %v1032_v26  ;;  %v2930_v45 = vpop.permute.xlu1 %1174  ;;  %v848_v18 = vunpack.c.l.b16 %v840_v11 }
 0x341   : > { %v1398_v35 = vmul.f32 0.2, %v1382_v28  ;;  %v1421_v36 = vsel %vm868_vm6, %v2910_v33, -inf  ;;  %v2920_v38 = vsel %vm2894_vm12, %v1040_v34, -1e+30  ;;  %vm1390_vm2 = vcmp.gt.f32.partialorder %v1382_v28, 0.0 }
 0x342   : > { %1422 = vmax.xlane.f32.xlu1 %v1421_v36  ;;  %v1062_v43 = vsel %vm868_vm6, %v2920_v38, -inf  ;;  %vm2974_vm15 = vcmp.ne.s32.totalorder %v848_v18, 0 }
 0x343   : > { %v1406_v39 = vsel %vm1390_vm2, %v1382_v28, %v1398_v35  ;;  %v2934_v47 = vpop.permute.xlu0 %1166  ;;  %v850_v28 = vunpack.c.l.b16 %v842_v17 }
 0x344   : > { %v2924_v41 = vsel %vm2914_vm1, %v1406_v39, -1e+30  ;;  %v1197_v39 = vadd.f32 %v2820_v30, %v2864_v56 }
 0x345   : > { %v1424_v44 = vsel %vm868_vm6, %v2924_v41, -inf  ;;  %v2932_v46 = vpop.permute.xlu1 %777  ;;  %vm2984_vm2 = vcmp.ne.s32.totalorder %v850_v28, 0 }
 0x346   : > { %1063 = vmax.xlane.f32.xlu1 %v1062_v43  ;;  %1425 = vmax.xlane.f32.xlu0 %v1424_v44  ;;  %v1213_v58 = vmul.f32 0.2, %v1197_v39  ;;  %vm1205_vm5 = vcmp.gt.f32.partialorder %v1197_v39, 0.0 }
 0x348   : > { %v1371_v49 = vpop.permute.xlu0 %1370  ;;  %v1221_v4 = vsel %vm1205_vm5, %v1197_v39, %v1213_v58 }
 0x349   : > { %v1387_v13 = vadd.f32 %v2848_v40, %v1371_v49 }
 0x34a   : > { %v983_v48 = vpop.permute.xlu1 %982 }
 0x34b   : > { %v1014_v62 = vadd.f32 %v2851_v42, %v983_v48  ;;  %v1403_v25 = vmul.f32 0.2, %v1387_v13  ;;  %vm1395_vm14 = vcmp.gt.f32.partialorder %v1387_v13, 0.0 }
 0x34d   : > { %v1003_v53 = vpop.permute.xlu0 %1002  ;;  %vm1022_vm8 = vcmp.gt.f32.partialorder %v1014_v62, 0.0  ;;  %v1411_v48 = vsel %vm1395_vm14, %v1387_v13, %v1403_v25 }
 0x34e   : > { %v1019_v26 = vadd.f32 %v2851_v42, %v1003_v53  ;;  %v2992_v53 = vsel %vm2984_vm2, %v1411_v48, -1e+30 }
 0x34f   : > { %v2937_v51 = vpop.permute.xlu1 %767 }
 0x350   : > { %v1035_v43 = vmul.f32 0.2, %v1019_v26  ;;  %vm1027_vm3 = vcmp.gt.f32.partialorder %v1019_v26, 0.0 }
 0x352   : > { %v2943_v55 = vpop.permute.xlu0 %1178  ;;  %v1043_v56 = vsel %vm1027_vm3, %v1019_v26, %v1035_v43 }
 0x353   : > { %v1201_v13 = vadd.f32 %v2820_v30, %v2943_v55 }
 0x354   : > { %v2941_v54 = vpop.permute.xlu1 %1186 }
 0x355   : > { %v1217_v17 = vmul.f32 0.2, %v1201_v13  ;;  %v1203_v26 = vadd.f32 %v2820_v30, %v2941_v54 }
 0x357   : > { %792 = vperm.xlu1 %2372, %v2808_v19   ;;  %v1367_v60 = vpop.permute.xlu0 %1366  ;;  %v1219_v43 = vmul.f32 0.2, %v1203_v26  ;;  %vm1211_vm3 = vcmp.gt.f32.partialorder %v1203_v26, 0.0 }
 0x358   : > { %v1386_v19 = vadd.f32 %v2848_v40, %v1367_v60  ;;  %v804_v60 = vadd.f32 %v2818_v29, %v2881_v2  ;;  %v3008_v2 = vsel %vm2859_vm7, %v1221_v4, -1e+30 }
 0x359   : > { %v2946_v59 = vpop.permute.xlu1 %1362  ;;  %v1237_v0 = vsel %vm868_vm6, %v3008_v2, -inf }
 0x35a   : > { %v1402_v8 = vmul.f32 0.2, %v1386_v19  ;;  %vm1394_vm9 = vcmp.gt.f32.partialorder %v1386_v19, 0.0 }
 0x35c   : > { %1190 = vperm.xlu0 %2373, %v2810_v21   ;;  %v1410_v16 = vsel %vm1394_vm9, %v1386_v19, %v1402_v8  ;;  %v3000_v19 = vsel %vm2984_vm2, %v1043_v56, -1e+30  ;;  %vm1207_vm9 = vcmp.gt.f32.partialorder %v1199_v63, 0.0 }
 0x35d   : > { %v2967_v24 = vsel %vm2954_vm11, %v1410_v16, -1e+30  ;;  %v1071_v5 = vsel %vm868_vm6, %v3000_v19, -inf }
 0x35e   : > { %v995_v1 = vpop.permute.xlu1 %994  ;;  %v1436_v34 = vsel %vm868_vm6, %v2967_v24, -inf }
 0x35f   : > { %v1017_v9 = vadd.f32 %v2851_v42, %v995_v1  ;;  %v820_v1 = vmul.f32 0.2, %v804_v60 }
 0x360   : > { %2374 = vset.pattern.permute.xlu0 %v2593_v31  ;;  %v1030_v31 = vmul.f32 0.2, %v1014_v62 }
 0x361   : > { %v1033_v14 = vmul.f32 0.2, %v1017_v9  ;;  %vm1025_vm13 = vcmp.gt.f32.partialorder %v1017_v9, 0.0 }
 0x362   : > { %v1038_v15 = vsel %vm1022_vm8, %v1014_v62, %v1030_v31  ;;  %v1439_v62 = vsel %vm868_vm6, %v2992_v53, -inf  ;;  %vm812_vm8 = vcmp.gt.f32.partialorder %v804_v60, 0.0  ;;  %v806_v31 = vadd.f32 %v2818_v29, %v2891_v7 }
 0x363   : > { %v2963_v23 = vsel %vm2914_vm1, %v1038_v15, -1e+30  ;;  %v1041_v27 = vsel %vm1025_vm13, %v1017_v9, %v1033_v14  ;;  %v828_v8 = vsel %vm812_vm8, %v804_v60, %v820_v1  ;;  %v1223_v14 = vsel %vm1207_vm9, %v1199_v63, %v1215_v6  ;;  %v783_v15 = vpop.permute.xlu1 %782 }
 0x364   : > { %v1056_v32 = vsel %vm868_vm6, %v2963_v23, -inf  ;;  %v2980_v36 = vsel %vm2974_vm15, %v1041_v27, -1e+30  ;;  %v3016_v9 = vsel %vm2859_vm7, %v828_v8, -1e+30  ;;  %vm814_vm10 = vcmp.gt.f32.partialorder %v806_v31, 0.0 }
 0x365   : > { %v1065_v49 = vsel %vm868_vm6, %v2980_v36, -inf  ;;  %v822_v11 = vmul.f32 0.2, %v806_v31  ;;  %v869_v7 = vsel %vm868_vm6, %v3016_v9, -inf  ;;  %v3025_v16 = vsel %vm2855_vm4, %v1223_v14, -1e+30 }
 0x366   : > { %v808_v18 = vadd.f32 %v2818_v29, %v783_v15  ;;  %vm1209_vm13 = vcmp.gt.f32.partialorder %v1201_v13, 0.0  ;;  %v1243_v55 = vsel %vm868_vm6, %v3025_v16, -inf  ;;  %v1227_v60 = vsel %vm1211_vm3, %v1203_v26, %v1219_v43 }
 0x367   : > { %v830_v25 = vsel %vm814_vm10, %v806_v31, %v822_v11  ;;  %v1225_v28 = vsel %vm1209_vm13, %v1201_v13, %v1217_v17  ;;  %v1385_v63 = vadd.f32 %v2848_v40, %v2946_v59 }
 0x368   : > { %v824_v27 = vmul.f32 0.2, %v808_v18  ;;  %vm816_vm14 = vcmp.gt.f32.partialorder %v808_v18, 0.0  ;;  %v3040_v39 = vsel %vm2974_vm15, %v1225_v28, -1e+30 }
 0x369   : > { %v1401_v6 = vmul.f32 0.2, %v1385_v63  ;;  %vm1393_vm5 = vcmp.gt.f32.partialorder %v1385_v63, 0.0 }
 0x36a   : > { %v832_v48 = vsel %vm816_vm14, %v808_v18, %v824_v27 }
 0x36b   : > { %v3046_v54 = vsel %vm2974_vm15, %v832_v48, -1e+30  ;;  %v1409_v11 = vsel %vm1393_vm5, %v1385_v63, %v1401_v6  ;;  %v1200_v48 = vadd.f32 %v2820_v30, %v2930_v45 }
 0x36c   : > { %v881_v56 = vsel %vm868_vm6, %v3046_v54, -inf  ;;  %v3064_v59 = vsel %vm2974_vm15, %v1409_v11, -1e+30 }
 0x36d   : > { %v1433_v18 = vsel %vm868_vm6, %v3064_v59, -inf  ;;  %v1216_v63 = vmul.f32 0.2, %v1200_v48 }
 0x37b   : > { %1057 = vmax.xlane.f32.xlu1 %v1056_v32  ;;  %1437 = vmax.xlane.f32.xlu0 %v1436_v34  ;;  %v1375_v32 = vpop.permute.xlu1 %1374 }
 0x37c   : > { %v1388_v8 = vadd.f32 %v2848_v40, %v1375_v32  ;;  %v805_v32 = vadd.f32 %v2818_v29, %v2937_v51 }
 0x37e   : > { %v1404_v14 = vmul.f32 0.2, %v1388_v8  ;;  %vm1396_vm10 = vcmp.gt.f32.partialorder %v1388_v8, 0.0  ;;  %vm813_vm5 = vcmp.gt.f32.partialorder %v805_v32, 0.0 }
 0x37f   : > { %1066 = vmax.xlane.f32.xlu0 %v1065_v49  ;;  %v1249_v49 = vsel %vm868_vm6, %v3040_v39, -inf  ;;  %v1007_v58 = vpop.permute.xlu1 %1006 }
 0x380   : > { %v1020_v15 = vadd.f32 %v2851_v42, %v1007_v58 }
 0x382   : > { %vm1028_vm14 = vcmp.gt.f32.partialorder %v1020_v15, 0.0 }
 0x383   : > { %1440 = vmax.xlane.f32.xlu0 %v1439_v62  ;;  %v3052_v62 = vsel %vm2984_vm2, %v1227_v60, -1e+30  ;;  %v999_v1 = vpop.permute.xlu1 %998 }
 0x384   : > { %v1255_v4 = vsel %vm868_vm6, %v3052_v62, -inf  ;;  %v1018_v31 = vadd.f32 %v2851_v42, %v999_v1  ;;  %v1412_v42 = vsel %vm1396_vm10, %v1388_v8, %v1404_v14  ;;  %v807_v1 = vadd.f32 %v2818_v29, %v2932_v46 }
 0x386   : > { %vm1026_vm9 = vcmp.gt.f32.partialorder %v1018_v31, 0.0  ;;  %v823_v6 = vmul.f32 0.2, %v807_v1 }
 0x387   : > { %1072 = vmax.xlane.f32.xlu0 %v1071_v5  ;;  %v422_v5 = vld [vmem:[%s2843_s13 + $0x1c] sm:$0xf]  ;;  %v1183_v60 = vpop.permute.xlu1 %1182 }
 0x388   : > { %vm430_vm8 = vcmp.gt.bf16.partialorder %v422_v5, 0 }
 0x389   : > { %v843_v13 = vsel %vm430_vm8, 65537, %v2596_v22  ;;  %v1198_v22 = vadd.f32 %v2820_v30, %v2934_v47  ;;  %vm1208_vm8 = vcmp.gt.f32.partialorder %v1200_v48, 0.0 }
 0x38a   : > { %v851_v17 = vunpack.c.l.b16 %v843_v13  ;;  %v1224_v8 = vsel %vm1208_vm8, %v1200_v48, %v1216_v63  ;;  %v1202_v63 = vadd.f32 %v2820_v30, %v1183_v60 }
 0x38b   : > { %1238 = vmax.xlane.f32.xlu0 %v1237_v0  ;;  %v1034_v0 = vmul.f32 0.2, %v1018_v31  ;;  %v1214_v28 = vmul.f32 0.2, %v1198_v22  ;;  %vm1206_vm3 = vcmp.gt.f32.partialorder %v1198_v22, 0.0 }
 0x38c   : > { %797 = vperm.xlu1 %2372, %v2810_v21   ;;  %v3032_v21 = vsel %vm2855_vm4, %v830_v25, -1e+30  ;;  %v1036_v25 = vmul.f32 0.2, %v1020_v15  ;;  %vm3075_vm13 = vcmp.ne.s32.totalorder %v851_v17, 0 }
 0x38d   : > { %v875_v34 = vsel %vm868_vm6, %v3032_v21, -inf  ;;  %v3083_v27 = vsel %vm3075_vm13, %v1412_v42, -1e+30  ;;  %v1222_v58 = vsel %vm1206_vm3, %v1198_v22, %v1214_v28  ;;  %v3113_v46 = vsel %vm2894_vm12, %v1224_v8, -1e+30 }
 0x38e   : > { %v1044_v47 = vsel %vm1028_vm14, %v1020_v15, %v1036_v25  ;;  %v1246_v14 = vsel %vm868_vm6, %v3113_v46, -inf  ;;  %vm1210_vm14 = vcmp.gt.f32.partialorder %v1202_v63, 0.0 }
 0x38f   : > { %870 = vmax.xlane.f32.xlu0 %v869_v7  ;;  %v1042_v7 = vsel %vm1026_vm9, %v1018_v31, %v1034_v0  ;;  %v3091_v43 = vsel %vm3075_vm13, %v1044_v47, -1e+30  ;;  %v788_v31 = vpop.permute.xlu1 %787  ;;  %vm815_vm9 = vcmp.gt.f32.partialorder %v807_v1, 0.0 }
 0x390   : > { %v3071_v40 = vsel %vm2954_vm11, %v1042_v7, -1e+30  ;;  %v1074_v51 = vsel %vm868_vm6, %v3091_v43, -inf  ;;  %v831_v13 = vsel %vm815_vm9, %v807_v1, %v823_v6 }
 0x391   : > { %v1068_v26 = vsel %vm868_vm6, %v3071_v40, -inf  ;;  %v3119_v15 = vsel %vm2894_vm12, %v831_v13, -1e+30 }
 0x393   : > { %1244 = vmax.xlane.f32.xlu0 %v1243_v55 }
 0x397   : > { %876 = vmax.xlane.f32.xlu0 %v875_v34  ;;  %v1442_v34 = vsel %vm868_vm6, %v3083_v27, -inf }
 0x39b   : > { %1250 = vmax.xlane.f32.xlu0 %v1249_v49  ;;  %v821_v49 = vmul.f32 0.2, %v805_v32 }
 0x39f   : > { %882 = vmax.xlane.f32.xlu0 %v881_v56  ;;  %v3099_v56 = vsel %vm2914_vm1, %v1222_v58, -1e+30 }
 0x3a0   : > { %v1240_v45 = vsel %vm868_vm6, %v3099_v56, -inf }
 0x3a3   : > { %1256 = vmax.xlane.f32.xlu0 %v1255_v4  ;;  %v829_v4 = vsel %vm813_vm5, %v805_v32, %v821_v49 }
 0x3a4   : > { %v3107_v5 = vsel %vm2914_vm1, %v829_v4, -1e+30  ;;  %v1218_v4 = vmul.f32 0.2, %v1202_v63 }
 0x3a5   : > { %v872_v0 = vsel %vm868_vm6, %v3107_v5, -inf }
 0x3b0   : > { %1434 = vmax.xlane.f32.xlu1 %v1433_v18  ;;  %v878_v18 = vsel %vm868_vm6, %v3119_v15, -inf }
 0x3b4   : > { %1069 = vmax.xlane.f32.xlu1 %v1068_v26 }
 0x3b8   : > { %1443 = vmax.xlane.f32.xlu1 %v1442_v34 }
 0x3bb   : > { %v1429_v11 = vpop.xlane.xlu1 %1428 }
 0x3bc   : > { %1075 = vmax.xlane.f32.xlu1 %v1074_v51  ;;  %v1055_v7 = vpop.xlane.xlu0 %1054  ;;  %v1447_v26 = vsub.f32 %v2868_v57, %v1429_v11 }
 0x3bd   : > { %v1077_v22 = vsub.f32 %v2875_v61, %v1055_v7  ;;  %v1226_v7 = vsel %vm1210_vm14, %v1202_v63, %v1218_v4 }
 0x3be   : > { %v1457_v48 = vmul.f32 1.442695, %v1447_v26 }
 0x3bf   : > { %v1085_v28 = vmul.f32 1.442695, %v1077_v22 }
 0x3c0   : > { %1241 = vmax.xlane.f32.xlu1 %v1240_v45  ;;  %v1061_v17 = vpop.xlane.xlu1 %1060  ;;  %v809_v45 = vadd.f32 %v2818_v29, %v788_v31 }
 0x3c1   : > { %v1079_v49 = vsub.f32 %v2885_v3, %v1061_v17 }
 0x3c2   : > { %vm817_vm5 = vcmp.gt.f32.partialorder %v809_v45, 0.0 }
 0x3c4   : > { %873 = vmax.xlane.f32.xlu1 %v872_v0 }
 0x3c8   : > { %1247 = vmax.xlane.f32.xlu1 %v1246_v14 }
 0x3cb   : > { %v1432_v47 = vpop.xlane.xlu0 %1431 }
 0x3cc   : > { %879 = vmax.xlane.f32.xlu1 %v878_v18 }
 0x3cf   : > { %v1423_v25 = vpop.xlane.xlu1 %1422 }
 0x3d0   : > { %v1445_v42 = vsub.f32 %v2910_v33, %v1423_v25  ;;  %v1089_v33 = vmul.f32 1.442695, %v1079_v49 }
 0x3d2   : > { %v1453_v32 = vmul.f32 1.442695, %v1445_v42  ;;  %v3157_v42 = vsel %vm2954_vm11, %v1226_v7, -1e+30 }
 0x3d3   : > { %v3126_v34 = vpop.xlane.xlu1 %1063  ;;  %v1426_v58 = vpop.xlane.xlu0 %1425 }
 0x3d4   : > { %2399 = vpow2.f32 %v1453_v32  ;;  %v1446_v4 = vsub.f32 %v2924_v41, %v1426_v58 }
 0x3d5   : > { %2401 = vpow2.f32 %v1085_v28 }
 0x3d6   : > { %2403 = vpow2.f32 %v1457_v48  ;;  %v1252_v48 = vsel %vm868_vm6, %v3157_v42, -inf }
 0x3d7   : > { %v793_v51 = vpop.permute.xlu1 %792  ;;  %2405 = vpow2.f32 %v1089_v33 }
 0x3d8   : > { %v810_v61 = vadd.f32 %v2818_v29, %v793_v51 }
 0x3da   : > { %v826_v1 = vmul.f32 0.2, %v810_v61  ;;  %vm818_vm10 = vcmp.gt.f32.partialorder %v810_v61, 0.0 }
 0x3db   : > { %v1191_v57 = vpop.permute.xlu0 %1190 }
 0x3dc   : > { %v1204_v6 = vadd.f32 %v2820_v30, %v1191_v57  ;;  %v834_v8 = vsel %vm818_vm10, %v810_v61, %v826_v1  ;;  %v825_v30 = vmul.f32 0.2, %v809_v45 }
 0x3dd   : > { %v3135_v3 = vsel %vm2984_vm2, %v834_v8, -1e+30 }
 0x3de   : > { %v2400_v0 = vpop.eup %2399  ;;  %v1220_v60 = vmul.f32 0.2, %v1204_v6  ;;  %v887_v11 = vsel %vm868_vm6, %v3135_v3, -inf  ;;  %vm1212_vm3 = vcmp.gt.f32.partialorder %v1204_v6, 0.0  ;;  %v833_v28 = vsel %vm817_vm5, %v809_v45, %v825_v30 }
 0x3df   : > { %888 = vmax.xlane.f32.xlu0 %v887_v11  ;;  %v3141_v13 = vsel %vm2859_vm7, %v2400_v0, 0.0  ;;  %v2402_v31 = vpop.eup %2401  ;;  %v3169_v51 = vsel %vm2954_vm11, %v833_v28, -1e+30  ;;  %v1455_v45 = vmul.f32 1.442695, %v1446_v4  ;;  %v1080_v11 = vsub.f32 %v2920_v38, %v3126_v34 }
 0x3e0   : > { %v1228_v14 = vsel %vm1212_vm3, %v1204_v6, %v1220_v60  ;;  %v1477_v18 = vsel %vm868_vm6, %v3141_v13, 0.0  ;;  %v3153_v25 = vsel %vm2859_vm7, %v2402_v31, 0.0  ;;  %v2404_v26 = vpop.eup %2403  ;;  %v884_v33 = vsel %vm868_vm6, %v3169_v51, -inf }
 0x3e1   : > { %v3145_v17 = vsel %vm3075_vm13, %v1228_v14, -1e+30  ;;  %v1109_v32 = vsel %vm868_vm6, %v3153_v25, 0.0  ;;  %v3165_v49 = vsel %vm2855_vm4, %v2404_v26, 0.0  ;;  %v2406_v63 = vpop.eup %2405  ;;  %v1448_v6 = vsub.f32 %v2903_v20, %v1432_v47 }
 0x3e2   : > { %v1258_v22 = vsel %vm868_vm6, %v3145_v17, -inf  ;;  %v1483_v61 = vsel %vm868_vm6, %v3165_v49, 0.0  ;;  %v3177_v1 = vsel %vm2855_vm4, %v2406_v63, 0.0  ;;  %2407 = vpow2.f32 %v1455_v45 }
 0x3e3   : > { %1478 = vadd.xlane.f32.xlu0 %v1477_v18  ;;  %1259 = vmax.xlane.f32.xlu1 %v1258_v22  ;;  %v1115_v57 = vsel %vm868_vm6, %v3177_v1, 0.0  ;;  %v1459_v60 = vmul.f32 1.442695, %v1448_v6  ;;  %v1091_v18 = vmul.f32 1.442695, %v1080_v11 }
 0x3e7   : > { %1110 = vadd.xlane.f32.xlu0 %v1109_v32  ;;  %1253 = vmax.xlane.f32.xlu1 %v1252_v48 }
 0x3eb   : > { %1484 = vadd.xlane.f32.xlu0 %v1483_v61  ;;  %885 = vmax.xlane.f32.xlu1 %v884_v33 }
 0x3ec   : > { %v2408_v20 = vpop.eup %2407 }
 0x3ef   : > { %1116 = vadd.xlane.f32.xlu0 %v1115_v57 }
 0x408   : > { %v1058_v8 = vpop.xlane.xlu1 %1057  ;;  %v1438_v30 = vpop.xlane.xlu0 %1437 }
 0x409   : > { %v1078_v0 = vsub.f32 %v2963_v23, %v1058_v8  ;;  %v1450_v41 = vsub.f32 %v2967_v24, %v1438_v30 }
 0x40b   : > { %v1087_v31 = vmul.f32 1.442695, %v1078_v0  ;;  %v1463_v38 = vmul.f32 1.442695, %v1450_v41 }
 0x40c   : > { %v798_v14 = vpop.permute.xlu1 %797  ;;  %v1067_v6 = vpop.xlane.xlu0 %1066 }
 0x40d   : > { %2409 = vpow2.f32 %v1087_v31  ;;  %v811_v7 = vadd.f32 %v2818_v29, %v798_v14  ;;  %v3196_v29 = vsel %vm2914_vm1, %v2408_v20, 0.0  ;;  %v1081_v31 = vsub.f32 %v2980_v36, %v1067_v6 }
 0x40e   : > { %2411 = vpow2.f32 %v1459_v60  ;;  %v1480_v24 = vsel %vm868_vm6, %v3196_v29, 0.0 }
 0x40f   : > { %v827_v58 = vmul.f32 0.2, %v811_v7  ;;  %vm819_vm8 = vcmp.gt.f32.partialorder %v811_v7, 0.0  ;;  %2413 = vpow2.f32 %v1091_v18  ;;  %v1093_v30 = vmul.f32 1.442695, %v1081_v31 }
 0x410   : > { %2415 = vpow2.f32 %v1463_v38  ;;  %v1441_v0 = vpop.xlane.xlu0 %1440 }
 0x411   : > { %v835_v47 = vsel %vm819_vm8, %v811_v7, %v827_v58  ;;  %v1451_v14 = vsub.f32 %v2992_v53, %v1441_v0  ;;  %2417 = vpow2.f32 %v1093_v30 }
 0x412   : > { %v3190_v23 = vsel %vm3075_vm13, %v835_v47, -1e+30 }
 0x413   : > { %v890_v34 = vsel %vm868_vm6, %v3190_v23, -inf  ;;  %v1465_v47 = vmul.f32 1.442695, %v1451_v14 }
 0x414   : > { %891 = vmax.xlane.f32.xlu1 %v890_v34  ;;  %v1073_v60 = vpop.xlane.xlu0 %1072 }
 0x415   : > { %v1083_v58 = vsub.f32 %v3000_v19, %v1073_v60 }
 0x417   : > { %v2410_v22 = vpop.eup %2409 }
 0x418   : > { %v2412_v26 = vpop.eup %2411  ;;  %1481 = vadd.xlane.f32.xlu1 %v1480_v24  ;;  %v3202_v28 = vsel %vm2914_vm1, %v2410_v22, 0.0  ;;  %v1239_v11 = vpop.xlane.xlu0 %1238  ;;  %v1097_v22 = vmul.f32 1.442695, %v1083_v58 }
 0x419   : > { %v1112_v32 = vsel %vm868_vm6, %v3202_v28, 0.0  ;;  %v3208_v48 = vsel %vm2894_vm12, %v2412_v26, 0.0  ;;  %v2414_v63 = vpop.eup %2413  ;;  %v1261_v36 = vsub.f32 %v3008_v2, %v1239_v11 }
 0x41a   : > { %v1486_v61 = vsel %vm868_vm6, %v3208_v48, 0.0  ;;  %v3214_v33 = vsel %vm2894_vm12, %v2414_v63, 0.0  ;;  %v2416_v57 = vpop.eup %2415 }
 0x41b   : > { %v1118_v4 = vsel %vm868_vm6, %v3214_v33, 0.0  ;;  %v3220_v45 = vsel %vm2954_vm11, %v2416_v57, 0.0 }
 0x41c   : > { %1113 = vadd.xlane.f32.xlu1 %v1112_v32  ;;  %v1492_v8 = vsel %vm868_vm6, %v3220_v45, 0.0  ;;  %v871_v7 = vpop.xlane.xlu0 %870 }
 0x41d   : > { %v893_v63 = vsub.f32 %v3016_v9, %v871_v7 }
 0x420   : > { %1487 = vadd.xlane.f32.xlu1 %v1486_v61  ;;  %v1245_v24 = vpop.xlane.xlu0 %1244 }
 0x421   : > { %v1263_v0 = vsub.f32 %v3025_v16, %v1245_v24 }
 0x424   : > { %1119 = vadd.xlane.f32.xlu1 %v1118_v4  ;;  %v877_v61 = vpop.xlane.xlu0 %876  ;;  %v2418_v4 = vpop.eup %2417 }
 0x425   : > { %v3243_v30 = vsel %vm2974_vm15, %v2418_v4, 0.0 }
 0x428   : > { %1493 = vadd.xlane.f32.xlu1 %v1492_v8  ;;  %v901_v8 = vmul.f32 1.442695, %v893_v63 }
 0x43d   : > { %v1435_v18 = vpop.xlane.xlu1 %1434 }
 0x43e   : > { %v1449_v41 = vsub.f32 %v3064_v59, %v1435_v18  ;;  %v1269_v59 = vmul.f32 1.442695, %v1261_v36  ;;  %v1273_v18 = vmul.f32 1.442695, %v1263_v0 }
 0x440   : > { %v1461_v20 = vmul.f32 1.442695, %v1449_v41  ;;  %v895_v41 = vsub.f32 %v3032_v21, %v877_v61 }
 0x441   : > { %v1070_v38 = vpop.xlane.xlu1 %1069 }
 0x442   : > { %2419 = vpow2.f32 %v1461_v20  ;;  %v1082_v34 = vsub.f32 %v3071_v40, %v1070_v38  ;;  %v1121_v38 = vsel %vm868_vm6, %v3243_v30, 0.0 }
 0x443   : > { %2421 = vpow2.f32 %v1465_v47 }
 0x444   : > { %v1095_v26 = vmul.f32 1.442695, %v1082_v34 }
 0x445   : > { %v1444_v53 = vpop.xlane.xlu1 %1443 }
 0x446   : > { %2423 = vpow2.f32 %v1095_v26  ;;  %v1452_v32 = vsub.f32 %v3083_v27, %v1444_v53 }
 0x447   : > { %2425 = vpow2.f32 %v1097_v22 }
 0x448   : > { %v1467_v19 = vmul.f32 1.442695, %v1452_v32 }
 0x449   : > { %v1076_v57 = vpop.xlane.xlu1 %1075 }
 0x44a   : > { %2427 = vpow2.f32 %v1467_v19  ;;  %v1084_v40 = vsub.f32 %v3091_v43, %v1076_v57  ;;  %v1251_v43 = vpop.xlane.xlu0 %1250 }
 0x44b   : > { %2429 = vpow2.f32 %v1269_v59  ;;  %v1265_v36 = vsub.f32 %v3040_v39, %v1251_v43 }
 0x44c   : > { %v2420_v6 = vpop.eup %2419  ;;  %v1099_v2 = vmul.f32 1.442695, %v1084_v40 }
 0x44d   : > { %v1242_v60 = vpop.xlane.xlu1 %1241  ;;  %v3236_v27 = vsel %vm2974_vm15, %v2420_v6, 0.0  ;;  %v2422_v31 = vpop.eup %2421  ;;  %v1277_v4 = vmul.f32 1.442695, %v1265_v36 }
 0x44e   : > { %2431 = vpow2.f32 %v1099_v2  ;;  %v1262_v9 = vsub.f32 %v3099_v56, %v1242_v60  ;;  %v1489_v11 = vsel %vm868_vm6, %v3236_v27, 0.0  ;;  %v3257_v34 = vsel %vm2984_vm2, %v2422_v31, 0.0  ;;  %v883_v26 = vpop.xlane.xlu0 %882 }
 0x44f   : > { %1490 = vadd.xlane.f32.xlu0 %v1489_v11  ;;  %2433 = vpow2.f32 %v901_v8  ;;  %v1495_v61 = vsel %vm868_vm6, %v3257_v34, 0.0  ;;  %v897_v8 = vsub.f32 %v3046_v54, %v883_v26 }
 0x450   : > { %v2424_v14 = vpop.eup %2423  ;;  %v1271_v16 = vmul.f32 1.442695, %v1262_v9 }
 0x451   : > { %v2426_v7 = vpop.eup %2425  ;;  %v874_v58 = vpop.xlane.xlu1 %873  ;;  %v3248_v56 = vsel %vm2954_vm11, %v2424_v14, 0.0 }
 0x452   : > { %2435 = vpow2.f32 %v1271_v16  ;;  %v894_v20 = vsub.f32 %v3107_v5, %v874_v58  ;;  %v1124_v47 = vsel %vm868_vm6, %v3248_v56, 0.0  ;;  %v3261_v24 = vsel %vm2984_vm2, %v2426_v7, 0.0  ;;  %v1257_v11 = vpop.xlane.xlu0 %1256 }
 0x453   : > { %1125 = vadd.xlane.f32.xlu1 %v1124_v47  ;;  %1122 = vadd.xlane.f32.xlu0 %v1121_v38  ;;  %2437 = vpow2.f32 %v1273_v18  ;;  %v905_v5 = vmul.f32 1.442695, %v895_v41  ;;  %v1127_v40 = vsel %vm868_vm6, %v3261_v24, 0.0  ;;  %v909_v16 = vmul.f32 1.442695, %v897_v8 }
 0x454   : > { %v2428_v21 = vpop.eup %2427  ;;  %v903_v22 = vmul.f32 1.442695, %v894_v20 }
 0x455   : > { %v1248_v53 = vpop.xlane.xlu1 %1247  ;;  %v3266_v32 = vsel %vm3075_vm13, %v2428_v21, 0.0  ;;  %v2430_v59 = vpop.eup %2429 }
 0x456   : > { %2439 = vpow2.f32 %v903_v22  ;;  %v1264_v19 = vsub.f32 %v3113_v46, %v1248_v53  ;;  %v1498_v63 = vsel %vm868_vm6, %v3266_v32, 0.0  ;;  %v3281_v46 = vsel %vm2859_vm7, %v2430_v59, 0.0 }
 0x457   : > { %1499 = vadd.xlane.f32.xlu1 %v1498_v63  ;;  %1496 = vadd.xlane.f32.xlu0 %v1495_v61  ;;  %2441 = vpow2.f32 %v905_v5  ;;  %v1293_v54 = vsel %vm868_vm6, %v3281_v46, 0.0 }
 0x458   : > { %v2432_v57 = vpop.eup %2431  ;;  %v1275_v39 = vmul.f32 1.442695, %v1264_v19 }
 0x459   : > { %v880_v6 = vpop.xlane.xlu1 %879  ;;  %v3277_v2 = vsel %vm3075_vm13, %v2432_v57, 0.0  ;;  %v2434_v9 = vpop.eup %2433 }
 0x45a   : > { %2443 = vpow2.f32 %v1275_v39  ;;  %v896_v0 = vsub.f32 %v3119_v15, %v880_v6  ;;  %v1130_v60 = vsel %vm868_vm6, %v3277_v2, 0.0  ;;  %v1267_v15 = vsub.f32 %v3052_v62, %v1257_v11 }
 0x45b   : > { %1131 = vadd.xlane.f32.xlu1 %v1130_v60  ;;  %1128 = vadd.xlane.f32.xlu0 %v1127_v40  ;;  %2445 = vpow2.f32 %v1277_v4  ;;  %v3298_v41 = vsel %vm2859_vm7, %v2434_v9, 0.0 }
 0x45c   : > { %v2436_v31 = vpop.eup %2435  ;;  %v907_v43 = vmul.f32 1.442695, %v896_v0  ;;  %v1281_v47 = vmul.f32 1.442695, %v1267_v15  ;;  %v925_v38 = vsel %vm868_vm6, %v3298_v41, 0.0 }
 0x45d   : > { %v3289_v14 = vsel %vm2914_vm1, %v2436_v31, 0.0  ;;  %v2438_v18 = vpop.eup %2437 }
 0x45e   : > { %2447 = vpow2.f32 %v907_v43  ;;  %v1296_v7 = vsel %vm868_vm6, %v3289_v14, 0.0  ;;  %v3310_v52 = vsel %vm2855_vm4, %v2438_v18, 0.0 }
 0x45f   : > { %1297 = vadd.xlane.f32.xlu1 %v1296_v7  ;;  %1294 = vadd.xlane.f32.xlu0 %v1293_v54  ;;  %2449 = vpow2.f32 %v909_v16  ;;  %v1299_v36 = vsel %vm868_vm6, %v3310_v52, 0.0 }
 0x460   : > { %v2440_v58 = vpop.eup %2439  ;;  %2451 = vpow2.f32 %v1281_v47 }
 0x461   : > { %v3302_v20 = vsel %vm2914_vm1, %v2440_v58, 0.0  ;;  %v2442_v21 = vpop.eup %2441 }
 0x462   : > { %v928_v62 = vsel %vm868_vm6, %v3302_v20, 0.0  ;;  %v3322_v53 = vsel %vm2855_vm4, %v2442_v21, 0.0 }
 0x463   : > { %929 = vadd.xlane.f32.xlu1 %v928_v62  ;;  %926 = vadd.xlane.f32.xlu0 %v925_v38  ;;  %v931_v61 = vsel %vm868_vm6, %v3322_v53, 0.0 }
 0x464   : > { %v2444_v22 = vpop.eup %2443 }
 0x465   : > { %v3314_v37 = vsel %vm2894_vm12, %v2444_v22, 0.0  ;;  %v2446_v26 = vpop.eup %2445 }
 0x466   : > { %v1302_v5 = vsel %vm868_vm6, %v3314_v37, 0.0  ;;  %v3334_v57 = vsel %vm2974_vm15, %v2446_v26, 0.0 }
 0x467   : > { %1303 = vadd.xlane.f32.xlu1 %v1302_v5  ;;  %1300 = vadd.xlane.f32.xlu0 %v1299_v36  ;;  %v1305_v12 = vsel %vm868_vm6, %v3334_v57, 0.0 }
 0x468   : > { %v2448_v59 = vpop.eup %2447 }
 0x469   : > { %v3326_v19 = vsel %vm2894_vm12, %v2448_v59, 0.0  ;;  %v2450_v50 = vpop.eup %2449 }
 0x46a   : > { %v934_v63 = vsel %vm868_vm6, %v3326_v19, 0.0  ;;  %v3341_v6 = vsel %vm2974_vm15, %v2450_v50, 0.0  ;;  %v2452_v8 = vpop.eup %2451 }
 0x46b   : > { %935 = vadd.xlane.f32.xlu1 %v934_v63  ;;  %932 = vadd.xlane.f32.xlu0 %v931_v61  ;;  %v937_v9 = vsel %vm868_vm6, %v3341_v6, 0.0 }
 0x46c   : > { %v889_v39 = vpop.xlane.xlu0 %888 }
 0x46d   : > { %v899_v40 = vsub.f32 %v3135_v3, %v889_v39  ;;  %v3348_v3 = vsel %vm2984_vm2, %v2452_v8, 0.0 }
 0x46e   : > { %v1311_v35 = vsel %vm868_vm6, %v3348_v3, 0.0 }
 0x46f   : > { %v913_v4 = vmul.f32 1.442695, %v899_v40  ;;  %1306 = vadd.xlane.f32.xlu0 %v1305_v12 }
 0x470   : > { %v1260_v0 = vpop.xlane.xlu1 %1259  ;;  %v1479_v18 = vpop.xlane.xlu0 %1478 }
 0x471   : > { %2453 = vpow2.f32 %v913_v4  ;;  %v1268_v60 = vsub.f32 %v3145_v17, %v1260_v0  ;;  %v1501_v62 = vmax.f32 %v1479_v18, 1e-12 }
 0x473   : > { %v1283_v11 = vmul.f32 1.442695, %v1268_v60  ;;  %938 = vadd.xlane.f32.xlu0 %v937_v9 }
 0x474   : > { %v1254_v7 = vpop.xlane.xlu1 %1253  ;;  %v1111_v47 = vpop.xlane.xlu0 %1110 }
 0x475   : > { %2455 = vpow2.f32 %v1283_v11  ;;  %v1266_v58 = vsub.f32 %v3157_v42, %v1254_v7  ;;  %v1133_v7 = vmax.f32 %v1111_v47, 1e-12 }
 0x476   : > { %2457 = vrcp.f32 %v1501_v62 }
 0x477   : > { %1312 = vadd.xlane.f32.xlu0 %v1311_v35  ;;  %v1279_v38 = vmul.f32 1.442695, %v1266_v58 }
 0x478   : > { %v886_v44 = vpop.xlane.xlu1 %885  ;;  %v1485_v26 = vpop.xlane.xlu0 %1484 }
 0x479   : > { %v898_v22 = vsub.f32 %v3169_v51, %v886_v44  ;;  %2459 = vpow2.f32 %v1279_v38  ;;  %v1503_v58 = vmax.f32 %v1485_v26, 1e-12 }
 0x47b   : > { %v2454_v31 = vpop.eup %2453  ;;  %v911_v63 = vmul.f32 1.442695, %v898_v22 }
 0x47c   : > { %v3354_v43 = vsel %vm2984_vm2, %v2454_v31, 0.0  ;;  %v1117_v42 = vpop.xlane.xlu0 %1116 }
 0x47d   : > { %v943_v17 = vsel %vm868_vm6, %v3354_v43, 0.0  ;;  %v1135_v12 = vmax.f32 %v1117_v42, 1e-12 }
 0x47e   : > { %944 = vadd.xlane.f32.xlu0 %v943_v17 }
 0x47f   : > { %v2456_v54 = vpop.eup %2455 }
 0x480   : > { %v3360_v16 = vsel %vm3075_vm13, %v2456_v54, 0.0  ;;  %v2458_v40 = vpop.eup %2457 }
 0x481   : > { %v1314_v15 = vsel %vm868_vm6, %v3360_v16, 0.0  ;;  %v1517_v35 = vmul.f32 %v2458_v40, %v3141_v13 }
 0x482   : > { %1315 = vadd.xlane.f32.xlu1 %v1314_v15 }
 0x483   : > { %v2460_v4 = vpop.eup %2459 }
 0x484   : > { %v3375_v11 = vsel %vm2954_vm11, %v2460_v4, 0.0 }
 0x485   : > { %v1308_v15 = vsel %vm868_vm6, %v3375_v11, 0.0 }
 0x4a1   : > { %v892_v21 = vpop.xlane.xlu1 %891 }
 0x4a2   : > { %v900_v5 = vsub.f32 %v3190_v23, %v892_v21 }
 0x4a4   : > { %v915_v36 = vmul.f32 1.442695, %v900_v5 }
 0x4a5   : > { %v1482_v59 = vpop.xlane.xlu1 %1481 }
 0x4a6   : > { %2461 = vpow2.f32 %v915_v36  ;;  %v1502_v61 = vmax.f32 %v1482_v59, 1e-12 }
 0x4a8   : > { %2463 = vrcp.f32 %v1502_v61 }
 0x4a9   : > { %v1114_v50 = vpop.xlane.xlu1 %1113  ;;  %2465 = vpow2.f32 %v911_v63 }
 0x4aa   : > { %2467 = vrcp.f32 %v1135_v12  ;;  %v1134_v55 = vmax.f32 %v1114_v50, 1e-12 }
 0x4ad   : > { %v1488_v39 = vpop.xlane.xlu1 %1487 }
 0x4ae   : > { %v1504_v13 = vmax.f32 %v1488_v39, 1e-12 }
 0x4b0   : > { %v2462_v8 = vpop.eup %2461 }
 0x4b1   : > { %v1120_v51 = vpop.xlane.xlu1 %1119  ;;  %v3369_v23 = vsel %vm3075_vm13, %v2462_v8, 0.0  ;;  %vm2037_vm13 = vcmask 8192  }
 0x4b2   : > { %v2464_v0 = vpop.eup %2463  ;;  %v1136_v60 = vmax.f32 %v1120_v51, 1e-12  ;;  %v946_v9 = vsel %vm868_vm6, %v3369_v23, 0.0 }
 0x4b3   : > { %947 = vadd.xlane.f32.xlu1 %v946_v9  ;;  %v1518_v31 = vmul.f32 %v2464_v0, %v3196_v29  ;;  %v2466_v17 = vpop.eup %2465 }
 0x4b4   : > { %2469 = vrcp.f32 %v1136_v60  ;;  %v3384_v18 = vsel %vm2954_vm11, %v2466_v17, 0.0  ;;  %v2468_v44 = vpop.eup %2467 }
 0x4b5   : > { %v1525_v54 = vpack.c.bf16 %v1518_v31, %v1517_v35  ;;  %2471 = vrcp.f32 %v1134_v55  ;;  %v940_v29 = vsel %vm868_vm6, %v3384_v18, 0.0  ;;  %v1151_v47 = vmul.f32 %v2468_v44, %v3177_v1 }
 0x4b6   : > { %2473 = vrcp.f32 %v1133_v7 }
 0x4b7   : > { %1309 = vadd.xlane.f32.xlu1 %v1308_v15  ;;  %1545 = vrot.lane.b32.xlu0 %v1525_v54, %s2597_s14  ;;  %2475 = vrcp.f32 %v1504_v13 }
 0x4b8   : > { %2477 = vrcp.f32 %v1503_v58 }
 0x4bb   : > { %941 = vadd.xlane.f32.xlu1 %v940_v29 }
 0x4be   : > { %v2470_v62 = vpop.eup %2469 }
 0x4bf   : > { %v1152_v38 = vmul.f32 %v2470_v62, %v3214_v33  ;;  %v2472_v10 = vpop.eup %2471  ;;  %v1494_v33 = vpop.xlane.xlu1 %1493 }
 0x4c0   : > { %v2474_v22 = vpop.eup %2473  ;;  %v1150_v5 = vmul.f32 %v2472_v10, %v3202_v28  ;;  %v1506_v42 = vmax.f32 %v1494_v33, 1e-12 }
 0x4c1   : > { %v1158_v21 = vpack.c.bf16 %v1152_v38, %v1151_v47  ;;  %v2476_v36 = vpop.eup %2475  ;;  %v1149_v59 = vmul.f32 %v2474_v22, %v3153_v25 }
 0x4c2   : > { %v2478_v26 = vpop.eup %2477  ;;  %v1520_v61 = vmul.f32 %v2476_v36, %v3208_v48  ;;  %2479 = vrcp.f32 %v1506_v42 }
 0x4c3   : > { %1535 = vrot.lane.b32.xlu0 %v1158_v21, %s2597_s14  ;;  %v1157_v63 = vpack.c.bf16 %v1150_v5, %v1149_v59  ;;  %v1519_v1 = vmul.f32 %v2478_v26, %v3165_v49 }
 0x4c5   : > { %v1526_v50 = vpack.c.bf16 %v1520_v61, %v1519_v1 }
 0x4cc   : > { %1533 = vrot.lane.b32.xlu1 %v1157_v63, %s2597_s14  ;;  %v2480_v49 = vpop.eup %2479 }
 0x4cd   : > { %v1522_v54 = vmul.f32 %v2480_v49, %v3220_v45 }
 0x4d0   : > { %1547 = vrot.lane.b32.xlu1 %v1526_v50, %s2597_s14 }
 0x4dc   : > { %v1491_v39 = vpop.xlane.xlu0 %1490 }
 0x4dd   : > { %v1505_v40 = vmax.f32 %v1491_v39, 1e-12 }
 0x4df   : > { %2481 = vrcp.f32 %v1505_v40 }
 0x4e0   : > { %v1126_v28 = vpop.xlane.xlu1 %1125  ;;  %v1123_v12 = vpop.xlane.xlu0 %1122 }
 0x4e1   : > { %v1138_v25 = vmax.f32 %v1126_v28, 1e-12  ;;  %v1137_v4 = vmax.f32 %v1123_v12, 1e-12 }
 0x4e3   : > { %2483 = vrcp.f32 %v1138_v25 }
 0x4e4   : > { %2485 = vrcp.f32 %v1137_v4  ;;  %v1500_v48 = vpop.xlane.xlu1 %1499  ;;  %v1497_v8 = vpop.xlane.xlu0 %1496 }
 0x4e5   : > { %v1508_v51 = vmax.f32 %v1500_v48, 1e-12  ;;  %v1507_v0 = vmax.f32 %v1497_v8, 1e-12 }
 0x4e7   : > { %2487 = vrcp.f32 %v1508_v51 }
 0x4e8   : > { %2489 = vrcp.f32 %v1507_v0  ;;  %v1132_v60 = vpop.xlane.xlu1 %1131  ;;  %v1129_v9 = vpop.xlane.xlu0 %1128 }
 0x4e9   : > { %v2482_v35 = vpop.eup %2481  ;;  %v1140_v31 = vmax.f32 %v1132_v60, 1e-12  ;;  %v1139_v17 = vmax.f32 %v1129_v9, 1e-12 }
 0x4ea   : > { %v1521_v55 = vmul.f32 %v2482_v35, %v3236_v27 }
 0x4eb   : > { %2491 = vrcp.f32 %v1140_v31 }
 0x4ec   : > { %2493 = vrcp.f32 %v1139_v17  ;;  %v1527_v15 = vpack.c.bf16 %v1522_v54, %v1521_v55 }
 0x4ed   : > { %v2484_v7 = vpop.eup %2483 }
 0x4ee   : > { %v2486_v13 = vpop.eup %2485  ;;  %1549 = vrot.lane.b32.xlu1 %v1527_v15, %s2597_s14  ;;  %v1154_v29 = vmul.f32 %v2484_v7, %v3248_v56 }
 0x4ef   : > { %v1153_v58 = vmul.f32 %v2486_v13, %v3243_v30  ;;  %v1295_v30 = vpop.xlane.xlu0 %1294 }
 0x4f0   : > { %v1317_v61 = vmax.f32 %v1295_v30, 1e-12 }
 0x4f1   : > { %v2488_v44 = vpop.eup %2487  ;;  %v1159_v62 = vpack.c.bf16 %v1154_v29, %v1153_v58 }
 0x4f2   : > { %v2490_v47 = vpop.eup %2489  ;;  %v1524_v38 = vmul.f32 %v2488_v44, %v3266_v32  ;;  %v1298_v32 = vpop.xlane.xlu1 %1297 }
 0x4f3   : > { %1537 = vrot.lane.b32.xlu0 %v1159_v62, %s2597_s14  ;;  %v1523_v45 = vmul.f32 %v2490_v47, %v3257_v34  ;;  %v927_v36 = vpop.xlane.xlu0 %926  ;;  %v1318_v63 = vmax.f32 %v1298_v32, 1e-12 }
 0x4f4   : > { %v949_v8 = vmax.f32 %v927_v36, 1e-12 }
 0x4f5   : > { %v2492_v27 = vpop.eup %2491  ;;  %v1528_v21 = vpack.c.bf16 %v1524_v38, %v1523_v45  ;;  %2495 = vrcp.f32 %v1318_v63 }
 0x4f6   : > { %v2494_v10 = vpop.eup %2493  ;;  %v1156_v22 = vmul.f32 %v2492_v27, %v3277_v2  ;;  %2497 = vrcp.f32 %v1317_v61  ;;  %v930_v25 = vpop.xlane.xlu1 %929 }
 0x4f7   : > { %1551 = vrot.lane.b32.xlu1 %v1528_v21, %s2597_s14  ;;  %v1155_v56 = vmul.f32 %v2494_v10, %v3261_v24  ;;  %v1301_v59 = vpop.xlane.xlu0 %1300  ;;  %v950_v48 = vmax.f32 %v930_v25, 1e-12 }
 0x4f8   : > { %v1319_v49 = vmax.f32 %v1301_v59, 1e-12 }
 0x4f9   : > { %v1160_v5 = vpack.c.bf16 %v1156_v22, %v1155_v56  ;;  %2499 = vrcp.f32 %v950_v48 }
 0x4fa   : > { %v1304_v4 = vpop.xlane.xlu1 %1303  ;;  %2501 = vrcp.f32 %v949_v8 }
 0x4fb   : > { %1539 = vrot.lane.b32.xlu0 %v1160_v5, %s2597_s14  ;;  %v933_v26 = vpop.xlane.xlu0 %932  ;;  %v1320_v0 = vmax.f32 %v1304_v4, 1e-12 }
 0x4fd   : > { %2503 = vrcp.f32 %v1320_v0 }
 0x4fe   : > { %v936_v51 = vpop.xlane.xlu1 %935  ;;  %2505 = vrcp.f32 %v1319_v49 }
 0x4ff   : > { %v1307_v34 = vpop.xlane.xlu0 %1306  ;;  %v2496_v50 = vpop.eup %2495 }
 0x500   : > { %v2498_v2 = vpop.eup %2497  ;;  %v1334_v42 = vmul.f32 %v2496_v50, %v3289_v14  ;;  %v951_v14 = vmax.f32 %v933_v26, 1e-12  ;;  %v1321_v45 = vmax.f32 %v1307_v34, 1e-12 }
 0x501   : > { %v1333_v24 = vmul.f32 %v2498_v2, %v3281_v46  ;;  %v952_v46 = vmax.f32 %v936_v51, 1e-12 }
 0x503   : > { %v939_v1 = vpop.xlane.xlu0 %938  ;;  %v1341_v40 = vpack.c.bf16 %v1334_v42, %v1333_v24  ;;  %2507 = vrcp.f32 %v952_v46  ;;  %v2500_v35 = vpop.eup %2499 }
 0x504   : > { %2509 = vrcp.f32 %v951_v14  ;;  %v2502_v31 = vpop.eup %2501  ;;  %v966_v54 = vmul.f32 %v2500_v35, %v3302_v20  ;;  %v953_v5 = vmax.f32 %v939_v1, 1e-12 }
 0x505   : > { %v965_v15 = vmul.f32 %v2502_v31, %v3298_v41 }
 0x507   : > { %v3409_v33 = vpop.xlane.xlu0 %1312  ;;  %v2504_v55 = vpop.eup %2503  ;;  %v973_v44 = vpack.c.bf16 %v966_v54, %v965_v15 }
 0x508   : > { %v2506_v7 = vpop.eup %2505  ;;  %v1336_v47 = vmul.f32 %v2504_v55, %v3314_v37  ;;  %v1323_v59 = vmax.f32 %v3409_v33, 1e-12 }
 0x509   : > { %v1335_v62 = vmul.f32 %v2506_v7, %v3310_v52 }
 0x50b   : > { %v3413_v39 = vpop.xlane.xlu0 %944  ;;  %v1342_v20 = vpack.c.bf16 %v1336_v47, %v1335_v62 }
 0x50d   : > { %v2508_v58 = vpop.eup %2507 }
 0x50e   : > { %v2510_v38 = vpop.eup %2509  ;;  %v968_v22 = vmul.f32 %v2508_v58, %v3326_v19  ;;  %v955_v19 = vmax.f32 %v3413_v39, 1e-12 }
 0x50f   : > { %v1316_v60 = vpop.xlane.xlu1 %1315  ;;  %v967_v41 = vmul.f32 %v2510_v38, %v3322_v53 }
 0x510   : > { %v1324_v37 = vmax.f32 %v1316_v60, 1e-12 }
 0x511   : > { %v974_v36 = vpack.c.bf16 %v968_v22, %v967_v41 }
 0x529   : > { %v1546_v28 = vpop.permute.xlu0 %1545 }
 0x52a   : > { %v1571_v12 = vsel %vm868_vm6, %v1341_v40, %v1546_v28 }
 0x52b   : > { %1768 = vmatprep.mubr.bf16.mxu0 %v1571_v12 }
 0x535   : > { %v1536_v30 = vpop.permute.xlu0 %1535 }
 0x536   : > { %v1559_v32 = vsel %vm868_vm6, %v974_v36, %v1536_v30 }
 0x540   : > { %v948_v9 = vpop.xlane.xlu1 %947 }
 0x541   : > { %v956_v53 = vmax.f32 %v948_v9, 1e-12 }
 0x544   : > { %v1310_v17 = vpop.xlane.xlu1 %1309 }
 0x545   : > { %v1322_v29 = vmax.f32 %v1310_v17, 1e-12 }
 0x547   : > { %2511 = vrcp.f32 %v1322_v29 }
 0x548   : > { %v942_v13 = vpop.xlane.xlu1 %941  ;;  %2513 = vrcp.f32 %v1321_v45 }
 0x549   : > { %v954_v10 = vmax.f32 %v942_v13, 1e-12 }
 0x54b   : > { %2515 = vrcp.f32 %v954_v10 }
 0x54c   : > { %v1534_v27 = vpop.permute.xlu1 %1533  ;;  %2517 = vrcp.f32 %v953_v5 }
 0x54d   : > { %v1555_v21 = vsel %vm868_vm6, %v973_v44, %v1534_v27  ;;  %2519 = vrcp.f32 %v1324_v37 }
 0x54e   : > { %1769 = vmatmul.mubr.bf16.vlgmr.msra.gmra.mrb[8].mxu0 %v1555_v21  ;;  %2521 = vrcp.f32 %v1323_v59 }
 0x54f   : > { %2523 = vrcp.f32 %v956_v53 }
 0x550   : > { %v1548_v56 = vpop.permute.xlu1 %1547  ;;  %2525 = vrcp.f32 %v955_v19 }
 0x551   : > { %v1575_v52 = vsel %vm868_vm6, %v1342_v20, %v1548_v56  ;;  %v2512_v26 = vpop.eup %2511 }
 0x552   : > { %1776 = vmatprep.mubr.bf16.mxu0 %v1575_v52  ;;  %v2514_v63 = vpop.eup %2513  ;;  %v1338_v61 = vmul.f32 %v2512_v26, %v3375_v11 }
 0x553   : > { %v1337_v1 = vmul.f32 %v2514_v63, %v3334_v57 }
 0x555   : > { %v2516_v34 = vpop.eup %2515  ;;  %v1343_v2 = vpack.c.bf16 %v1338_v61, %v1337_v1 }
 0x556   : > { %1777 = vmatmul.mubr.bf16.gmra.mrb[12].mxu0 %v1559_v32  ;;  %v2518_v50 = vpop.eup %2517  ;;  %v970_v24 = vmul.f32 %v2516_v34, %v3384_v18 }
 0x557   : > { %v2520_v42 = vpop.eup %2519  ;;  %v969_v28 = vmul.f32 %v2518_v50, %v3341_v6 }
 0x558   : > { %v2522_v39 = vpop.eup %2521  ;;  %v1340_v25 = vmul.f32 %v2520_v42, %v3360_v16 }
 0x559   : > { %v975_v12 = vpack.c.bf16 %v970_v24, %v969_v28  ;;  %v2524_v11 = vpop.eup %2523  ;;  %v1339_v57 = vmul.f32 %v2522_v39, %v3348_v3  ;;  %v3442_v3 = vld [vmem:[%s3603_s8] ss:$0 sm:$0xff] }
 0x55a   : > { %v2526_v8 = vpop.eup %2525  ;;  %v972_v18 = vmul.f32 %v2524_v11, %v3369_v23 }
 0x55b   : > { %v1344_v51 = vpack.c.bf16 %v1340_v25, %v1339_v57  ;;  %v971_v6 = vmul.f32 %v2526_v8, %v3354_v43  ;;  %v1960_v25 = vld [vmem:[%s3604_s9 + $0x8] sm:$0xff]  ;;  %v1962_v57 = vld [vmem:[%s3604_s9 + $0x18] sm:$0xff] }
 0x55d   : > { %v976_v60 = vpack.c.bf16 %v972_v18, %v971_v6 }
 0x560   : > { %v1550_v33 = vpop.permute.xlu1 %1549 }
 0x561   : > { %v1579_v40 = vsel %vm868_vm6, %v1343_v2, %v1550_v33 }
 0x562   : > { %1784 = vmatprep.mubr.bf16.mxu0 %v1579_v40 }
 0x565   : > { %v1538_v4 = vpop.permute.xlu0 %1537 }
 0x566   : > { %v1563_v48 = vsel %vm868_vm6, %v975_v12, %v1538_v4  ;;  %v1959_v12 = vld [vmem:[%s3604_s9] sm:$0xff]  ;;  %v2600_v4 = vmov 0.0|0.0  }
 0x567   : > { %1785 = vmatmul.mubr.bf16.gmra.mrb[16].mxu0 %v1563_v48  ;;  %v2292_v11 = vpack.c.bf16 %v1960_v25, %v1959_v12  ;;  %2291 = vmatprep.subr.bf16.mxu1 %v2600_v4  ;;  %v1961_v48 = vld [vmem:[%s3604_s9 + $0x10] sm:$0xff] }
 0x568   : > { %v2295_v8 = vpack.c.bf16 %v1962_v57, %v1961_v48 }
 0x569   : > { %v1552_v0 = vpop.permute.xlu1 %1551  ;;  %2293 = vmatpush3.bf16.msra.mxu1 %v2292_v11 }
 0x56a   : > { %v1583_v49 = vsel %vm868_vm6, %v1344_v51, %v1552_v0  ;;  %2294 = vmatprep.subr.bf16.mxu1 %v2600_v4 }
 0x56b   : > { %1792 = vmatprep.mubr.bf16.mxu0 %v1583_v49 }
 0x56d   : > { %v1540_v46 = vpop.permute.xlu0 %1539  ;;  %2296 = vmatpush3.bf16.msra.mxu1 %v2295_v8 }
 0x56e   : > { %v1567_v16 = vsel %vm868_vm6, %v976_v60, %v1540_v46 }
 0x56f   : > { %1793 = vmatmul.mubr.bf16.gmra.mrb[20].mxu0 %v1567_v16 }
 0x621   : > { %v2205_v14 = vpop.f32.mrb[8].mxu0 }
 0x622   : > { %v2206_v9 = vpop.f32.mrb[9].mxu0 }
 0x623   : > { %v2207_v35 = vadd.f32 %v2206_v9, %v2205_v14  ;;  %v2208_v23 = vpop.f32.mrb[10].mxu0 }
 0x624   : > { %v2209_v31 = vpop.f32.mrb[11].mxu0 }
 0x625   : > { %v1771_v17 = vadd.f32 %v2207_v35, %v3442_v3  ;;  %v2210_v55 = vadd.f32 %v2209_v31, %v2208_v23 }
 0x627   : > { %v1809_v43 = vmul.f32 0.01, %v1771_v17  ;;  %v1774_v54 = vadd.f32 %v2210_v55, %v3442_v3  ;;  %vm1801_vm4 = vcmp.gt.f32.partialorder %v1771_v17, 0.0 }
 0x629   : > { %v1810_v15 = vmul.f32 0.01, %v1774_v54  ;;  %v2211_v7 = vpop.f32.mrb[12].mxu0  ;;  %v3446_v13 = vsel %vm1801_vm4, %v1771_v17, %v1809_v43  ;;  %vm1802_vm6 = vcmp.gt.f32.partialorder %v1774_v54, 0.0 }
 0x62a   : > { %1865 = vrot.lane.b32.xlu0 %v3446_v13, %s2597_s14  ;;  %1833 = vrot.lane.b32.xlu1 %v3446_v13, %s2598_s22  ;;  %v2212_v29 = vpop.f32.mrb[13].mxu0 }
 0x62b   : > { %v2213_v58 = vadd.f32 %v2212_v29, %v2211_v7  ;;  %v2214_v44 = vpop.f32.mrb[14].mxu0  ;;  %v3453_v45 = vsel %vm1802_vm6, %v1774_v54, %v1810_v15 }
 0x62c   : > { %v2215_v62 = vpop.f32.mrb[15].mxu0 }
 0x62d   : > { %v1779_v47 = vadd.f32 %v2213_v58, %v3442_v3  ;;  %v2216_v38 = vadd.f32 %v2215_v62, %v2214_v44 }
 0x62e   : > { %1897 = vrot.lane.b32.xlu0 %v3446_v13, %s2599_s24  ;;  %1867 = vrot.lane.b32.xlu1 %v3453_v45, %s2597_s14 }
 0x62f   : > { %v1811_v27 = vmul.f32 0.01, %v1779_v47  ;;  %v1782_v21 = vadd.f32 %v2216_v38, %v3442_v3  ;;  %vm1803_vm7 = vcmp.gt.f32.partialorder %v1779_v47, 0.0 }
 0x631   : > { %v1812_v10 = vmul.f32 0.01, %v1782_v21  ;;  %v3464_v20 = vsel %vm1803_vm7, %v1779_v47, %v1811_v27  ;;  %vm1804_vm12 = vcmp.gt.f32.partialorder %v1782_v21, 0.0 }
 0x632   : > { %1835 = vrot.lane.b32.xlu0 %v3453_v45, %s2598_s22  ;;  %1899 = vrot.lane.b32.xlu1 %v3453_v45, %s2599_s24 }
 0x633   : > { %v3470_v41 = vsel %vm1804_vm12, %v1782_v21, %v1812_v10 }
 0x636   : > { %1901 = vrot.lane.b32.xlu0 %v3464_v20, %s2599_s24  ;;  %1837 = vrot.lane.b32.xlu1 %v3464_v20, %s2598_s22 }
 0x63a   : > { %v2217_v22 = vpop.f32.mrb[16].mxu0  ;;  %1839 = vrot.lane.b32.xlu0 %v3470_v41, %s2598_s22  ;;  %1869 = vrot.lane.b32.xlu1 %v3464_v20, %s2597_s14 }
 0x63b   : > { %v2218_v56 = vpop.f32.mrb[17].mxu0 }
 0x63c   : > { %v2219_v5 = vadd.f32 %v2218_v56, %v2217_v22  ;;  %v2220_v52 = vpop.f32.mrb[18].mxu0 }
 0x63d   : > { %v2221_v30 = vpop.f32.mrb[19].mxu0 }
 0x63e   : > { %v1787_v37 = vadd.f32 %v2219_v5, %v3442_v3  ;;  %v2222_v36 = vadd.f32 %v2221_v30, %v2220_v52  ;;  %1871 = vrot.lane.b32.xlu1 %v3470_v41, %s2597_s14 }
 0x640   : > { %v1813_v59 = vmul.f32 0.01, %v1787_v37  ;;  %v1790_v32 = vadd.f32 %v2222_v36, %v3442_v3  ;;  %vm1805_vm1 = vcmp.gt.f32.partialorder %v1787_v37, 0.0 }
 0x642   : > { %v1814_v53 = vmul.f32 0.01, %v1790_v32  ;;  %v2223_v26 = vpop.f32.mrb[20].mxu0  ;;  %1903 = vrot.lane.b32.xlu1 %v3470_v41, %s2599_s24  ;;  %v3482_v19 = vsel %vm1805_vm1, %v1787_v37, %v1813_v59  ;;  %vm1806_vm11 = vcmp.gt.f32.partialorder %v1790_v32, 0.0 }
 0x643   : > { %1841 = vrot.lane.b32.xlu0 %v3482_v19, %s2598_s22  ;;  %v2224_v63 = vpop.f32.mrb[21].mxu0 }
 0x644   : > { %v2225_v61 = vadd.f32 %v2224_v63, %v2223_v26  ;;  %v2226_v34 = vpop.f32.mrb[22].mxu0  ;;  %v3486_v50 = vsel %vm1806_vm11, %v1790_v32, %v1814_v53 }
 0x645   : > { %v2227_v1 = vpop.f32.mrb[23].mxu0 }
 0x646   : > { %v1795_v2 = vadd.f32 %v2225_v61, %v3442_v3  ;;  %v2228_v33 = vadd.f32 %v2227_v1, %v2226_v34  ;;  %1843 = vrot.lane.b32.xlu1 %v3486_v50, %s2598_s22 }
 0x647   : > { %1873 = vrot.lane.b32.xlu0 %v3482_v19, %s2597_s14 }
 0x648   : > { %v1798_v24 = vadd.f32 %v2228_v33, %v3442_v3  ;;  %v1815_v42 = vmul.f32 0.01, %v1795_v2  ;;  %vm1807_vm15 = vcmp.gt.f32.partialorder %v1795_v2, 0.0 }
 0x64a   : > { %1875 = vrot.lane.b32.xlu1 %v3486_v50, %s2597_s14  ;;  %v1816_v40 = vmul.f32 0.01, %v1798_v24  ;;  %v3500_v28 = vsel %vm1807_vm15, %v1795_v2, %v1815_v42  ;;  %vm1808_vm2 = vcmp.gt.f32.partialorder %v1798_v24, 0.0 }
 0x64b   : > { %1905 = vrot.lane.b32.xlu0 %v3482_v19, %s2599_s24 }
 0x64c   : > { %v3504_v39 = vsel %vm1808_vm2, %v1798_v24, %v1816_v40 }
 0x64e   : > { %1907 = vrot.lane.b32.xlu1 %v3486_v50, %s2599_s24 }
 0x64f   : > { %1845 = vrot.lane.b32.xlu0 %v3500_v28, %s2598_s22 }
 0x652   : > { %1847 = vrot.lane.b32.xlu1 %v3504_v39, %s2598_s22  ;;  %s392_s22 = sand.u32 1, %s2581_s18  }
 0x653   : > { %1877 = vrot.lane.b32.xlu0 %v3500_v28, %s2597_s14  ;;  %s393_s30 = scalar_lea.vmem [#allocation2], %s392_s22  ;;  %s2040_s16 = scalar_lea.sflag [#allocation3], %s392_s22 }
 0x654   : > { %s2052_s12 = sshll.u32 %s393_s30, 4  ;;  %s3555_s12 = int_to_ptr.vmem [resolvable:$true] %s2052_s12 }
 0x655   : > { %p2534_p0 = scmp.lt.s32.totalorder %s3555_s12, %s2532_s25 }
 0x656   : > { %1909 = vrot.lane.b32.xlu1 %v3500_v28, %s2599_s24 }
 0x657   : > { %1879 = vrot.lane.b32.xlu0 %v3504_v39, %s2597_s14  ;;  %s3553_s14 = scalar_lea.hbm %s3606_s11, %s2162_s29 }
 0x65b   : > { %1911 = vrot.lane.b32.xlu0 %v3504_v39, %s2599_s24  ;;  %s2527_s24 = scalar_lea.vmem %s3555_s12, 16 }
 0x65c   : > { %p2528_p11 = scmp.ne.s32.totalorder %s3555_s12, %s2527_s24  ;;  %p2535_p1 = scmp.lt.s32.totalorder %s2533_s0, %s2527_s24 }
 0x65e   : > { %p2529_p12 = pnand %p2528_p11, %p2700_p5  ;;  %p2536_p2 = por %p2535_p1, %p2534_p0 }
 0x660   : > { %p2530_p13 = pneg %p2529_p12 }
 0x662   : > { %p2537_p3 = pnand %p2536_p2, %p2530_p13 }
 0x69c   : > { %v1834_v51 = vpop.permute.xlu1 %1833  ;;  %v1866_v18 = vpop.permute.xlu0 %1865 }
 0x69d   : > { %v1857_v17 = vadd.f32 %v1834_v51, %v3446_v13 }
 0x69f   : > { %v1889_v7 = vadd.f32 %v1866_v18, %v1857_v17  ;;  %v1963_v17 = vld [vmem:[%s3605_s10] sm:$0x1] }
 0x6a0   : > { %v1868_v0 = vpop.permute.xlu1 %1867  ;;  %v1898_v49 = vpop.permute.xlu0 %1897 }
 0x6a1   : > { %v1921_v38 = vadd.f32 %v1898_v49, %v1889_v7 }
 0x6a3   : > { %v1929_v52 = vmul.f32 0.25, %v1921_v38 }
 0x6a4   : > { %v1900_v6 = vpop.permute.xlu1 %1899  ;;  %v1836_v60 = vpop.permute.xlu0 %1835 }
 0x6a5   : > { %v1858_v35 = vadd.f32 %v1836_v60, %v3453_v45 }
 0x6a7   : > { %v1890_v55 = vadd.f32 %v1868_v0, %v1858_v35 }
 0x6a8   : > { %v1838_v46 = vpop.permute.xlu1 %1837  ;;  %v1902_v16 = vpop.permute.xlu0 %1901 }
 0x6a9   : > { %v1859_v43 = vadd.f32 %v1838_v46, %v3464_v20  ;;  %v1922_v58 = vadd.f32 %v1900_v6, %v1890_v55 }
 0x6ab   : > { %v1930_v10 = vmul.f32 0.25, %v1922_v58 }
 0x6ac   : > { %v1870_v14 = vpop.permute.xlu1 %1869  ;;  %v1840_v9 = vpop.permute.xlu0 %1839 }
 0x6ad   : > { %v1891_v29 = vadd.f32 %v1870_v14, %v1859_v43  ;;  %v1860_v44 = vadd.f32 %v1840_v9, %v3470_v41  ;;  %v1938_v41 = vsel %vm474_vm0, %v1930_v10, 0.0 }
 0x6af   : > { %v1923_v27 = vadd.f32 %v1902_v16, %v1891_v29 }
 0x6b0   : > { %v1872_v3 = vpop.permute.xlu1 %1871 }
 0x6b1   : > { %v1892_v21 = vadd.f32 %v1872_v3, %v1860_v44  ;;  %v1931_v30 = vmul.f32 0.25, %v1923_v27 }
 0x6b3   : > { %v1940_v61 = vsel %vm474_vm0, %v1931_v30, 0.0 }
 0x6b4   : > { %v1904_v23 = vpop.permute.xlu1 %1903 }
 0x6b5   : > { %v1842_v31 = vpop.permute.xlu0 %1841  ;;  %v1924_v22 = vadd.f32 %v1904_v23, %v1892_v21 }
 0x6b6   : > { %v1861_v45 = vadd.f32 %v1842_v31, %v3482_v19  ;;  %v1937_v19 = vsel %vm474_vm0, %v1929_v52, 0.0 }
 0x6b7   : > { %v1932_v59 = vmul.f32 0.25, %v1924_v22  ;;  %v1939_v1 = vadd.f32 %v1938_v41, %v1937_v19 }
 0x6b8   : > { %v1844_v54 = vpop.permute.xlu1 %1843 }
 0x6b9   : > { %v1874_v15 = vpop.permute.xlu0 %1873  ;;  %v1862_v13 = vadd.f32 %v1844_v54, %v3486_v50  ;;  %v1942_v2 = vsel %vm474_vm0, %v1932_v59, 0.0  ;;  %v1941_v42 = vadd.f32 %v1940_v61, %v1939_v1 }
 0x6ba   : > { %v1893_v56 = vadd.f32 %v1874_v15, %v1861_v45 }
 0x6bc   : > { %v1876_v62 = vpop.permute.xlu1 %1875 }
 0x6bd   : > { %v1906_v47 = vpop.permute.xlu0 %1905  ;;  %v1894_v37 = vadd.f32 %v1876_v62, %v1862_v13 }
 0x6be   : > { %v1925_v36 = vadd.f32 %v1906_v47, %v1893_v56 }
 0x6c0   : > { %v1908_v20 = vpop.permute.xlu1 %1907  ;;  %v1933_v34 = vmul.f32 0.25, %v1925_v36 }
 0x6c1   : > { %v1846_v5 = vpop.permute.xlu0 %1845  ;;  %v1926_v32 = vadd.f32 %v1908_v20, %v1894_v37 }
 0x6c2   : > { %v1863_v26 = vadd.f32 %v1846_v5, %v3500_v28  ;;  %v1944_v25 = vsel %vm474_vm0, %v1933_v34, 0.0  ;;  %v1943_v28 = vadd.f32 %v1942_v2, %v1941_v42 }
 0x6c3   : > { %v1934_v33 = vmul.f32 0.25, %v1926_v32 }
 0x6c4   : > { %v1848_v53 = vpop.permute.xlu1 %1847  ;;  %v1945_v8 = vadd.f32 %v1944_v25, %v1943_v28 }
 0x6c5   : > { %v1878_v63 = vpop.permute.xlu0 %1877  ;;  %v1864_v11 = vadd.f32 %v1848_v53, %v3504_v39  ;;  %v1946_v48 = vsel %vm474_vm0, %v1934_v33, 0.0 }
 0x6c6   : > { %v1895_v50 = vadd.f32 %v1878_v63, %v1863_v26  ;;  %v1947_v49 = vadd.f32 %v1946_v48, %v1945_v8 }
 0x6c8   : > { %v1910_v24 = vpop.permute.xlu1 %1909 }
 0x6c9   : > { %v1927_v40 = vadd.f32 %v1910_v24, %v1895_v50  ;;  %v1880_v12 = vpop.permute.xlu0 %1879 }
 0x6ca   : > { %v1896_v57 = vadd.f32 %v1880_v12, %v1864_v11 }
 0x6cb   : > { %v1935_v4 = vmul.f32 0.25, %v1927_v40 }
 0x6cd   : > { %v1912_v51 = vpop.permute.xlu0 %1911  ;;  %v1948_v18 = vsel %vm474_vm0, %v1935_v4, 0.0 }
 0x6ce   : > { %v1928_v0 = vadd.f32 %v1912_v51, %v1896_v57  ;;  %v1949_v60 = vadd.f32 %v1948_v18, %v1947_v49 }
 0x6d0   : > { %v1936_v6 = vmul.f32 0.25, %v1928_v0 }
 0x6d2   : > { %v1950_v46 = vsel %vm474_vm0, %v1936_v6, 0.0 }
 0x6d3   : > { %v1951_v16 = vadd.f32 %v1950_v46, %v1949_v60 }
 0x6d5   : > { %v1952_v14 = vrot.slane %v1951_v16, 4 }
 0x6d7   : > { %v1953_v39 = vadd.f32 %v1952_v14, %v1951_v16 }
 0x6d9   : > { %v1954_v3 = vrot.slane %v1953_v39, 2 }
 0x6db   : > { %v1955_v9 = vadd.f32 %v1954_v3, %v1953_v39 }
 0x6dd   : > { %v1956_v35 = vrot.slane %v1955_v9, 1 }
 0x6df   : > { %v1957_v23 = vadd.f32 %v1956_v35, %v1955_v9 }
 0x6e1   : > { %v1958_v31 = vmul.f32 0.015625, %v1957_v23 }
 0x6e3   : > { %2289 = vmatmul.mubr.msk.f32.vlgmr.msra.gmra.mrb[20].mxu1 %vm474_vm0, %v1958_v31 }
 0x7b6   : > { %v2033_v55 = vpop.f32.mrb[20].mxu1 }
 0x7b7   : > { %v2034_v43 = vadd.f32 %v2033_v55, %v1963_v17  ;;  %v2290_v54 = vpop.f32.mrb[21].mxu1 }
 0x7b9   : > { %2038 = vst.msk [vmem:[%s393_s30] sm:$0x1] %vm2037_vm13, %v2034_v43 }
 0x7ba   : > { %2540 = shalt.err (!%p2537_p3)
}
 0x7bb   : > { %s2541_s22 = scalar_lea.hbm %s3553_s14, 16  ;;  %s2545_s13 = scalar_lea.hbm %s3606_s11, 32 }
 0x7bc   : > { %p2542_p4 = scmp.ne.s32.totalorder %s3553_s14, %s2541_s22  ;;  %p2546_p9 = scmp.lt.u32.totalorder %s3553_s14, %s3606_s11 }
 0x7bd   : > { %p2547_p10 = scmp.lt.u32.totalorder %s2545_s13, %s2541_s22  ;;  %p2549_p12 = scmp.lt.u32.totalorder %s2541_s22, %s3553_s14 }
 0x7be   : > { %p2543_p7 = pnand %p2542_p4, %p2700_p5 }
 0x7bf   : > { %p2548_p11 = por %p2547_p10, %p2546_p9 }
 0x7c0   : > { %p2544_p8 = pneg %p2543_p7 }
 0x7c1   : > { %p2550_p13 = por %p2549_p12, %p2548_p11 }
 0x7c3   : > { %p2551_p0 = pnand %p2550_p13, %p2544_p8 }
 0x7c5   : > { %2554 = shalt.err (!%p2551_p0)
}
 0x7c6   : > { %2297 = dma.vmem_to_hbm [thread:$0]  (%p2700_p5), %s3555_s12, 16, %s3553_s14, %s2040_s16  }
 0x7c7 PF: > { %p2303_p1 = scmp.ge.s32.totalorder %s2589_s20, 2  ;;  %s2064_s0 = sand.u32 1, %s2577_s17  }
 0x7c8   : > { %s2065_s24 = scalar_lea.sflag [#allocation3], %s2064_s0 }
 0x7c9   : > { %p2300_p2 = pnand %p2303_p1, %p2704_p6 }
 0x7cb   : > { %2572 = dma.done.wait (!%p2300_p2), %s2065_s24, 16  }
 0x7cc   : > { %2574 = vsyncadd (!%p2300_p2), %s2065_s24, 4294967280  ;;  %p21_p3 = scmp.ge.s32.totalorder %s2687_s23, 4   ;;  %s3627_s17 = smov %s2581_s18 }
 0x7cd   : > { %s3628_s18 = smov %s2585_s19  ;;  %s3629_s19 = smov %s2698_s26 }
 0x7ce   : > { %s3630_s20 = smov %s2687_s23  ;;  %23 = sbr.rel (!%p21_p3) target bundleno = 5 (0x5), region = 102 }
 0x7d5   :  { %2069 = vsyncpa [#allocation3], 1 }
 0x7d6   :  { %2071 = vsyncpa [#allocation3 + $0x1], 1 }

</bundles_post_ra>
